<compile_context>
chip_gen: v5e
topology: v5e:2x2
jax: 0.10.0
libtpu: 0.0.40
codegen_flags: <defaults>
</compile_context>

<pallas_src>
import functools

import jax
import jax.numpy as jnp
from jax import lax
from jax.experimental import pallas as pl
from jax.experimental.pallas import tpu as pltpu


# ----------------------------------------------------------------------------
# helpers shared by kernels and reference
# ----------------------------------------------------------------------------
def _sigmoid(x):
    return 1.0 / (1.0 + jnp.exp(-x))


def _softplus(x):
    # numerically stable softplus built only from exp/log/abs/max (EUP-friendly)
    return jnp.maximum(x, 0.0) + jnp.log(1.0 + jnp.exp(-jnp.abs(x)))


def _group_matrix(C, n_head, head_size):
    # G[c, h] = 1.0 if channel c belongs to head h else 0.0  (built in-kernel,
    # tiny (C, H) indicator used for per-head reduce / broadcast via MXU)
    cidx = lax.broadcasted_iota(jnp.int32, (C, n_head), 0)
    hidx = lax.broadcasted_iota(jnp.int32, (C, n_head), 1)
    lo = hidx * head_size
    mask = (cidx >= lo) & (cidx < lo + head_size)
    return jnp.where(mask, 1.0, 0.0).astype(jnp.float32)


# rows of the packed per-channel parameter block (16, C)
_XR, _XW, _XK, _XV, _XA, _XG = 0, 1, 2, 3, 4, 5
_KK, _KA, _W0, _A0, _V0, _RK, _LNW, _LNB = 6, 7, 8, 9, 10, 11, 12, 13
_PP_ROWS = 16


# ----------------------------------------------------------------------------
# kernel 1: token mixes + projections
# ----------------------------------------------------------------------------
def mix_proj_kernel(x_ref, xp_ref, vf_ref, pp_ref,
                    wr_ref, wk_ref, wv_ref,
                    w1_ref, w2_ref, a1_ref, a2_ref,
                    v1_ref, v2_ref, g1_ref, g2_ref,
                    r_o, w_o, k_o, v_o, z_o, b_o, g_o,
                    *, n_head, head_size, use_vfirst):
    f32 = jnp.float32
    dot = lambda a, b: jnp.dot(a, b, preferred_element_type=f32)
    row = lambda i: pp_ref[i:i + 1, :]

    x = x_ref[...]
    xx = xp_ref[...] - x                               # time_shift(x) - x
    xr = x + xx * row(_XR)
    xw = x + xx * row(_XW)
    xk = x + xx * row(_XK)
    xv = x + xx * row(_XV)
    xa = x + xx * row(_XA)
    xg = x + xx * row(_XG)

    r = dot(xr, wr_ref[...])
    k = dot(xk, wk_ref[...])
    v = dot(xv, wv_ref[...])

    # w = -softplus(-(w0 + tanh(xw @ w1) @ w2)) - 0.5 ; recurrence uses exp(-exp(w))
    m = row(_W0) + dot(jnp.tanh(dot(xw, w1_ref[...])), w2_ref[...])
    w_log = -_softplus(-m) - 0.5
    w_decay = jnp.exp(-jnp.exp(w_log))

    a = _sigmoid(row(_A0) + dot(dot(xa, a1_ref[...]), a2_ref[...]))
    g = dot(_sigmoid(dot(xg, g1_ref[...])), g2_ref[...])

    if use_vfirst:  # layer_id != 0
        vmix = _sigmoid(row(_V0) + dot(dot(xv, v1_ref[...]), v2_ref[...]))
        v = v + (vf_ref[...] - v) * vmix

    # kk = per-head L2-normalised (k * k_k)   (group reduce via indicator matmul)
    C = x.shape[-1]
    G = _group_matrix(C, n_head, head_size)                     # (C, H)
    kk = k * row(_KK)
    ss = lax.dot_general(kk * kk, G, (((1,), (0,)), ((), ())),
                         preferred_element_type=f32)             # (tm, H)
    inv = 1.0 / jnp.maximum(jnp.sqrt(ss), 1e-12)
    inv_c = lax.dot_general(inv, G, (((1,), (1,)), ((), ())),
                            preferred_element_type=f32)          # (tm, C)
    kk = kk * inv_c

    r_o[...] = r
    w_o[...] = w_decay
    k_o[...] = k * (1.0 + (a - 1.0) * row(_KA))
    v_o[...] = v
    z_o[...] = -kk
    b_o[...] = kk * a
    g_o[...] = g


# ----------------------------------------------------------------------------
# kernel 2: WKV-7 recurrence  (one grid step per (batch, head))
# ----------------------------------------------------------------------------
def wkv7_kernel(r_ref, w_ref, k_ref, v_ref, z_ref, b_ref, o_ref):
    Tc, N = r_ref.shape
    f32 = jnp.float32
    eye = jnp.where(lax.broadcasted_iota(jnp.int32, (N, N), 0) ==
                    lax.broadcasted_iota(jnp.int32, (N, N), 1),
                    1.0, 0.0).astype(f32)
    dn = (((1,), (1,)), ((), ()))   # contract last dims  (A @ B^T pattern)

    def step(t, S):                 # S[i, j]: i = value channel, j = key channel
        r_row = r_ref[pl.ds(t, 1), :]
        w_row = w_ref[pl.ds(t, 1), :]
        k_row = k_ref[pl.ds(t, 1), :]
        v_row = v_ref[pl.ds(t, 1), :]
        z_row = z_ref[pl.ds(t, 1), :]
        b_row = b_ref[pl.ds(t, 1), :]
        # sa_i = sum_j S[i,j] * z_j   -> single MXU dot (no VPU mul + XLU reduce)
        sa_col = lax.dot_general(S, z_row, dn, preferred_element_type=f32)    # (N,1)
        # v as a column without any transpose: eye @ v^T (MXU)
        v_col = lax.dot_general(eye, v_row, dn, preferred_element_type=f32)   # (N,1)
        S = S * w_row + v_col * k_row + sa_col * b_row
        # y_i = sum_j S[i,j] * r_j, produced directly as a row for the store
        y_row = lax.dot_general(r_row, S, dn, preferred_element_type=f32)     # (1,N)
        o_ref[pl.ds(t, 1), :] = y_row
        return S

    # (N,N) f32 state = 16 KiB -> 4 vregs, carried in registers across the loop.
    unroll = True if Tc <= 64 else 8
    lax.fori_loop(0, Tc, step, jnp.zeros((N, N), f32), unroll=unroll)


# ----------------------------------------------------------------------------
# kernel 3: groupnorm + residual + gate + output projection
# ----------------------------------------------------------------------------
def post_kernel(y_ref, r_ref, k_ref, v_ref, g_ref, pp_ref, wo_ref, o_ref,
                *, n_head, head_size, eps):
    f32 = jnp.float32
    row = lambda i: pp_ref[i:i + 1, :]
    C = y_ref.shape[-1]
    G = _group_matrix(C, n_head, head_size)
    to_h = lambda t: lax.dot_general(t, G, (((1,), (0,)), ((), ())),
                                     preferred_element_type=f32)   # (tm, H)
    to_c = lambda t: lax.dot_general(t, G, (((1,), (1,)), ((), ())),
                                     preferred_element_type=f32)   # (tm, C)

    y = y_ref[...]
    inv_n = 1.0 / head_size
    mean_h = to_h(y) * inv_n
    var_h = to_h(y * y) * inv_n - mean_h * mean_h                  # biased var
    inv_std_h = 1.0 / jnp.sqrt(var_h + eps)
    y = (y - to_c(mean_h)) * to_c(inv_std_h) * row(_LNW) + row(_LNB)

    # x = x + ((r * k * r_k).sum per head) * v
    rk_h = to_h(r_ref[...] * k_ref[...] * row(_RK))
    y = y + to_c(rk_h) * v_ref[...]

    o_ref[...] = jnp.dot(y * g_ref[...], wo_ref[...],
                         preferred_element_type=f32)


# ----------------------------------------------------------------------------
# wrapper
# ----------------------------------------------------------------------------
def _pad_rows(a, mp):
    m = a.shape[0]
    if m == mp:
        return a
    return jnp.concatenate([a, jnp.zeros((mp - m,) + a.shape[1:], a.dtype)], 0)


def rwkv_tmix_x070(x, v_first, p, *, layer_id, n_head, head_size,
                   head_size_divisor=8, row_tile=256):
    """Forward pass of RWKV_Tmix_x070.  Returns (out, v_first_out)."""
    f32 = jnp.float32
    B, T, C = x.shape
    assert C == n_head * head_size
    eps = 1e-5 * head_size_divisor ** 2

    x = x.astype(f32)
    v_first = v_first.astype(f32)
    # time_shift = ZeroPad2d((0,0,1,-1)): prepend a zero row along T, drop last.
    x_prev = jnp.concatenate([jnp.zeros((B, 1, C), f32), x[:, :-1, :]], axis=1)

    M = B * T
    tm = row_tile if M >= row_tile else M
    Mp = pl.cdiv(M, tm) * tm
    grid = (Mp // tm,)

    x2 = _pad_rows(x.reshape(M, C), Mp)
    xp2 = _pad_rows(x_prev.reshape(M, C), Mp)
    vf2 = _pad_rows(v_first.reshape(M, C), Mp)

    # packed per-channel parameters -> one lane-dense (16, C) block
    pp = jnp.stack(
        [p['x_r'], p['x_w'], p['x_k'], p['x_v'], p['x_a'], p['x_g'],
         p['k_k'], p['k_a'], p['w0'], p['a0'], p['v0'],
         p['r_k'].reshape(C), p['ln_w'], p['ln_b'],
         jnp.zeros((C,), f32), jnp.zeros((C,), f32)], axis=0).astype(f32)

    row_spec = pl.BlockSpec((tm, C), lambda i: (i, 0))

    def const(shape):
        return pl.BlockSpec(shape, lambda i: (0, 0))

    cparams = pltpu.CompilerParams(dimension_semantics=("parallel",),
                                   vmem_limit_bytes=32 * 1024 * 1024)

    # ---- kernel 1: mixes + projections -------------------------------------
    d_dec, d_aaa = p['w1'].shape[1], p['a1'].shape[1]
    d_mv, d_gate = p['v1'].shape[1], p['g1'].shape[1]
    mix_fn = functools.partial(mix_proj_kernel, n_head=n_head,
                               head_size=head_size,
                               use_vfirst=(layer_id != 0))
    r_, w_, k_, v_, z_, b_, g_ = pl.pallas_call(
        mix_fn,
        out_shape=tuple(jax.ShapeDtypeStruct((Mp, C), f32) for _ in range(7)),
        grid_spec=pltpu.PrefetchScalarGridSpec(
            num_scalar_prefetch=0, grid=grid,
            in_specs=[row_spec, row_spec, row_spec, const((_PP_ROWS, C)),
                      const((C, C)), const((C, C)), const((C, C)),
                      const((C, d_dec)), const((d_dec, C)),
                      const((C, d_aaa)), const((d_aaa, C)),
                      const((C, d_mv)), const((d_mv, C)),
                      const((C, d_gate)), const((d_gate, C))],
            out_specs=tuple(row_spec for _ in range(7))),
        compiler_params=cparams,
    )(x2, xp2, vf2, pp, p['Wr'], p['Wk'], p['Wv'],
      p['w1'], p['w2'], p['a1'], p['a2'], p['v1'], p['v2'], p['g1'], p['g2'])

    # ---- kernel 2: WKV-7 recurrence ----------------------------------------
    def to_bh(t):   # (Mp, C) -> (B*H, T, N)
        t = t[:M].reshape(B, T, n_head, head_size)
        return jnp.transpose(t, (0, 2, 1, 3)).reshape(B * n_head, T, head_size)

    seq_spec = pl.BlockSpec((None, T, head_size), lambda i: (i, 0, 0))
    y_bh = pl.pallas_call(
        wkv7_kernel,
        out_shape=jax.ShapeDtypeStruct((B * n_head, T, head_size), f32),
        grid_spec=pltpu.PrefetchScalarGridSpec(
            num_scalar_prefetch=0, grid=(B * n_head,),
            in_specs=[seq_spec] * 6, out_specs=seq_spec),
        compiler_params=pltpu.CompilerParams(
            dimension_semantics=("parallel",)),
    )(to_bh(r_), to_bh(w_), to_bh(k_), to_bh(v_), to_bh(z_), to_bh(b_))
    y2 = _pad_rows(
        jnp.transpose(y_bh.reshape(B, n_head, T, head_size),
                      (0, 2, 1, 3)).reshape(M, C), Mp)

    # ---- kernel 3: groupnorm + residual + gate + output projection ---------
    post_fn = functools.partial(post_kernel, n_head=n_head,
                                head_size=head_size, eps=eps)
    out2 = pl.pallas_call(
        post_fn,
        out_shape=jax.ShapeDtypeStruct((Mp, C), f32),
        grid_spec=pltpu.PrefetchScalarGridSpec(
            num_scalar_prefetch=0, grid=grid,
            in_specs=[row_spec] * 5 + [const((_PP_ROWS, C)), const((C, C))],
            out_specs=row_spec),
        compiler_params=cparams,
    )(y2, r_, k_, v_, g_, pp, p['Wo'])

    out = out2[:M].reshape(B, T, C)
    v_first_out = v_[:M].reshape(B, T, C) if layer_id == 0 else v_first
    return out, v_first_out


# ----------------------------------------------------------------------------
# parameters (deterministic) and pure-JAX reference
# ----------------------------------------------------------------------------
def init_params(C, n_head, head_size, n_layer, layer_id, key):
    """Shapes mirror RWKV_Tmix_x070; Linear weights stored in (in, out) layout
    so no per-call transpose is needed.  NOTE: the PyTorch module zero-inits
    several tensors (w1/a1/v1/g1, r_k, output.weight) which would make the
    forward output degenerate/zero; small deterministic random values are used
    instead so the kernels are actually exercised."""
    f32 = jnp.float32
    ratio_0_to_1 = layer_id / (n_layer - 1)
    ratio_1_to_almost0 = 1.0 - layer_id / n_layer
    ddd = jnp.arange(C, dtype=f32) / C

    def u(k, shape, bound):
        return jax.random.uniform(k, shape, f32, -bound, bound)

    ks = jax.random.split(key, 16)
    p = {
        'x_r': 1.0 - jnp.power(ddd, 0.2 * ratio_1_to_almost0),
        'x_w': 1.0 - jnp.power(ddd, 0.9 * ratio_1_to_almost0),
        'x_k': 1.0 - (jnp.power(ddd, 0.9 * ratio_1_to_almost0) + 0.4 * ratio_0_to_1),
        'x_v': 1.0 - (jnp.power(ddd, 0.4 * ratio_1_to_almost0) + 0.6 * ratio_0_to_1),
        'x_a': 1.0 - jnp.power(ddd, 0.9 * ratio_1_to_almost0),
        'x_g': 1.0 - jnp.power(ddd, 0.2 * ratio_1_to_almost0),
        'k_k': jnp.full((C,), 0.85, f32),
        'k_a': jnp.ones((C,), f32),
        'a0': jnp.zeros((C,), f32),
        'v0': jnp.ones((C,), f32),
        'r_k': u(ks[0], (n_head, head_size), 0.3),
        'ln_w': 1.0 + u(ks[1], (C,), 0.1),
        'ln_b': u(ks[2], (C,), 0.1),
    }
    n = jnp.arange(C, dtype=f32)
    decay_speed = -7.0 + 5.0 * jnp.power(n / (C - 1), 0.85 + ratio_0_to_1 ** 0.5)
    p['w0'] = decay_speed + 0.5

    bound = 1.0 / (C ** 0.5)
    p['Wr'] = u(ks[3], (C, C), 0.5 * bound)
    p['Wk'] = u(ks[4], (C, C), 0.05 * bound)
    p['Wv'] = u(ks[5], (C, C), 0.5 * bound)
    p['Wo'] = u(ks[6], (C, C), 0.5 * bound)

    d_dec, d_aaa, d_mv, d_gate = 64, 64, 32, 128
    p['w1'] = u(ks[7], (C, d_dec), 0.1)
    p['w2'] = u(ks[8], (d_dec, C), 0.1)
    p['a1'] = u(ks[9], (C, d_aaa), 0.1)
    p['a2'] = u(ks[10], (d_aaa, C), 0.1)
    p['v1'] = u(ks[11], (C, d_mv), 0.1)
    p['v2'] = u(ks[12], (d_mv, C), 0.1)
    p['g1'] = u(ks[13], (C, d_gate), 0.1)
    p['g2'] = u(ks[14], (d_gate, C), 0.1)
    return p


def _wkv7_ref(r, w, k, v, z, b):
    # all (B, T, H, N); w is the decay factor exp(-exp(log_w))
    B, T, H, N = r.shape

    def step(S, xs):
        r_t, w_t, k_t, v_t, z_t, b_t = xs
        sa = jnp.einsum('bhij,bhj->bhi', S, z_t)
        S = (S * w_t[:, :, None, :]
             + v_t[:, :, :, None] * k_t[:, :, None, :]
             + sa[:, :, :, None] * b_t[:, :, None, :])
        y = jnp.einsum('bhij,bhj->bhi', S, r_t)
        return S, y

    xs = tuple(jnp.moveaxis(t, 1, 0) for t in (r, w, k, v, z, b))
    S0 = jnp.zeros((B, H, N, N), jnp.float32)
    _, ys = lax.scan(step, S0, xs)
    return jnp.moveaxis(ys, 0, 1)


def reference_forward(x, v_first, p, *, layer_id, n_head, head_size,
                      head_size_divisor=8):
    f32 = jnp.float32
    B, T, C = x.shape
    eps = 1e-5 * head_size_divisor ** 2
    x_prev = jnp.concatenate([jnp.zeros((B, 1, C), f32), x[:, :-1, :]], axis=1)
    xx = x_prev - x
    xr = x + xx * p['x_r']; xw = x + xx * p['x_w']; xk = x + xx * p['x_k']
    xv = x + xx * p['x_v']; xa = x + xx * p['x_a']; xg = x + xx * p['x_g']

    r = xr @ p['Wr']
    w_log = -_softplus(-(p['w0'] + jnp.tanh(xw @ p['w1']) @ p['w2'])) - 0.5
    k = xk @ p['Wk']
    v = xv @ p['Wv']
    if layer_id == 0:
        v_first = v
    else:
        v = v + (v_first - v) * _sigmoid(p['v0'] + (xv @ p['v1']) @ p['v2'])
    a = _sigmoid(p['a0'] + (xa @ p['a1']) @ p['a2'])
    g = _sigmoid(xg @ p['g1']) @ p['g2']

    kk = k * p['k_k']
    kk4 = kk.reshape(B, T, n_head, head_size)
    norm = jnp.maximum(jnp.sqrt(jnp.sum(kk4 * kk4, -1, keepdims=True)), 1e-12)
    kk = (kk4 / norm).reshape(B, T, C)
    k = k * (1.0 + (a - 1.0) * p['k_a'])

    hs = lambda t: t.reshape(B, T, n_head, head_size)
    y = _wkv7_ref(hs(r), hs(jnp.exp(-jnp.exp(w_log))), hs(k), hs(v),
                  hs(-kk), hs(kk * a)).reshape(B, T, C)

    y4 = y.reshape(B * T, n_head, head_size)
    mu = jnp.mean(y4, axis=-1, keepdims=True)
    var = jnp.mean((y4 - mu) ** 2, axis=-1, keepdims=True)
    y = (((y4 - mu) / jnp.sqrt(var + eps)).reshape(B * T, C)
         * p['ln_w'] + p['ln_b']).reshape(B, T, C)

    rsum = jnp.sum(hs(r) * hs(k) * p['r_k'], axis=-1, keepdims=True)
    y = y + (rsum * hs(v)).reshape(B, T, C)
    out = (y * g) @ p['Wo']
    return out, v_first


# ----------------------------------------------------------------------------
if __name__ == "__main__":
    B, T = 2, 16                 # T is a multiple of CHUNK_LEN = 16
    head_size, n_head = 64, 2    # head size fixed at 64 by RUN_CUDA_RWKV7g
    C = head_size * n_head       # n_embd = dim_att = 128 (lane-dense)
    n_layer, layer_id = 4, 1     # layer_id != 0 -> exercises the v_first mix

    root = jax.random.PRNGKey(0)
    kx, kv, kp = jax.random.split(root, 3)
    x = jax.random.normal(kx, (B, T, C), jnp.float32)
    v_first = jax.random.normal(kv, (B, T, C), jnp.float32)
    params = init_params(C, n_head, head_size, n_layer, layer_id, kp)

    out, v_first_out = rwkv_tmix_x070(x, v_first, params, layer_id=layer_id,
                                      n_head=n_head, head_size=head_size)
    out = jax.block_until_ready(out)

    ref_out, ref_vf = reference_forward(x, v_first, params, layer_id=layer_id,
                                        n_head=n_head, head_size=head_size)
    assert out.shape == (B, T, C)
    max_err = float(jnp.max(jnp.abs(out - ref_out)))
    assert jnp.allclose(out, ref_out, atol=2e-2, rtol=2e-2), \
        f"mismatch vs reference (max abs err {max_err:.3e})"
    assert jnp.allclose(v_first_out, ref_vf), "v_first mismatch"
    print("KERNEL_OK")
</pallas_src>

<mosaic_0001>
module attributes {stable_mosaic.version = 11 : i64} {
  func.func @mix_proj_kernel(%arg0: i32, %arg1: memref<32x128xf32, #tpu.memory_space<vmem>>, %arg2: memref<32x128xf32, #tpu.memory_space<vmem>>, %arg3: memref<32x128xf32, #tpu.memory_space<vmem>>, %arg4: memref<16x128xf32, #tpu.memory_space<vmem>>, %arg5: memref<128x128xf32, #tpu.memory_space<vmem>>, %arg6: memref<128x128xf32, #tpu.memory_space<vmem>>, %arg7: memref<128x128xf32, #tpu.memory_space<vmem>>, %arg8: memref<128x64xf32, #tpu.memory_space<vmem>>, %arg9: memref<64x128xf32, #tpu.memory_space<vmem>>, %arg10: memref<128x64xf32, #tpu.memory_space<vmem>>, %arg11: memref<64x128xf32, #tpu.memory_space<vmem>>, %arg12: memref<128x32xf32, #tpu.memory_space<vmem>>, %arg13: memref<32x128xf32, #tpu.memory_space<vmem>>, %arg14: memref<128x128xf32, #tpu.memory_space<vmem>>, %arg15: memref<128x128xf32, #tpu.memory_space<vmem>>, %arg16: memref<32x128xf32, #tpu.memory_space<vmem>>, %arg17: memref<32x128xf32, #tpu.memory_space<vmem>>, %arg18: memref<32x128xf32, #tpu.memory_space<vmem>>, %arg19: memref<32x128xf32, #tpu.memory_space<vmem>>, %arg20: memref<32x128xf32, #tpu.memory_space<vmem>>, %arg21: memref<32x128xf32, #tpu.memory_space<vmem>>, %arg22: memref<32x128xf32, #tpu.memory_space<vmem>>) attributes {dimension_semantics = [#tpu.dimension_semantics<parallel>], iteration_bounds = array<i64: 1>, scalar_prefetch = 0 : i64, scratch_operands = 0 : i64, tpu.core_type = #tpu.core_type<tc>, window_params = [{transform_indices = @transform_0, window_bounds = array<i64: 32, 128>}, {transform_indices = @transform_1, window_bounds = array<i64: 32, 128>}, {transform_indices = @transform_2, window_bounds = array<i64: 32, 128>}, {pipeline_mode = #tpu.pipeline_mode<synchronous>, transform_indices = @transform_3, window_bounds = array<i64: 16, 128>}, {pipeline_mode = #tpu.pipeline_mode<synchronous>, transform_indices = @transform_4, window_bounds = array<i64: 128, 128>}, {pipeline_mode = #tpu.pipeline_mode<synchronous>, transform_indices = @transform_5, window_bounds = array<i64: 128, 128>}, {pipeline_mode = #tpu.pipeline_mode<synchronous>, transform_indices = @transform_6, window_bounds = array<i64: 128, 128>}, {pipeline_mode = #tpu.pipeline_mode<synchronous>, transform_indices = @transform_7, window_bounds = array<i64: 128, 64>}, {pipeline_mode = #tpu.pipeline_mode<synchronous>, transform_indices = @transform_8, window_bounds = array<i64: 64, 128>}, {pipeline_mode = #tpu.pipeline_mode<synchronous>, transform_indices = @transform_9, window_bounds = array<i64: 128, 64>}, {pipeline_mode = #tpu.pipeline_mode<synchronous>, transform_indices = @transform_10, window_bounds = array<i64: 64, 128>}, {pipeline_mode = #tpu.pipeline_mode<synchronous>, transform_indices = @transform_11, window_bounds = array<i64: 128, 32>}, {pipeline_mode = #tpu.pipeline_mode<synchronous>, transform_indices = @transform_12, window_bounds = array<i64: 32, 128>}, {pipeline_mode = #tpu.pipeline_mode<synchronous>, transform_indices = @transform_13, window_bounds = array<i64: 128, 128>}, {pipeline_mode = #tpu.pipeline_mode<synchronous>, transform_indices = @transform_14, window_bounds = array<i64: 128, 128>}, {transform_indices = @transform_15, window_bounds = array<i64: 32, 128>}, {transform_indices = @transform_16, window_bounds = array<i64: 32, 128>}, {transform_indices = @transform_17, window_bounds = array<i64: 32, 128>}, {transform_indices = @transform_18, window_bounds = array<i64: 32, 128>}, {transform_indices = @transform_19, window_bounds = array<i64: 32, 128>}, {transform_indices = @transform_20, window_bounds = array<i64: 32, 128>}, {transform_indices = @transform_21, window_bounds = array<i64: 32, 128>}]} {
    %c0 = arith.constant 0 : index
    %c0_0 = arith.constant 0 : index
    %0 = vector.load %arg1[%c0, %c0_0] : memref<32x128xf32, #tpu.memory_space<vmem>>, vector<32x128xf32>
    %c0_1 = arith.constant 0 : index
    %c0_2 = arith.constant 0 : index
    %1 = vector.load %arg2[%c0_1, %c0_2] : memref<32x128xf32, #tpu.memory_space<vmem>>, vector<32x128xf32>
    %2 = arith.subf %1, %0 : vector<32x128xf32>
    %c0_3 = arith.constant 0 : index
    %c0_4 = arith.constant 0 : index
    %3 = vector.load %arg4[%c0_3, %c0_4] : memref<16x128xf32, #tpu.memory_space<vmem>>, vector<1x128xf32>
    %4 = vector.broadcast %3 : vector<1x128xf32> to vector<32x128xf32>
    %5 = arith.mulf %2, %4 : vector<32x128xf32>
    %6 = arith.addf %0, %5 : vector<32x128xf32>
    %c1 = arith.constant 1 : index
    %c0_5 = arith.constant 0 : index
    %7 = vector.load %arg4[%c1, %c0_5] : memref<16x128xf32, #tpu.memory_space<vmem>>, vector<1x128xf32>
    %8 = vector.broadcast %7 : vector<1x128xf32> to vector<32x128xf32>
    %9 = arith.mulf %2, %8 : vector<32x128xf32>
    %10 = arith.addf %0, %9 : vector<32x128xf32>
    %c2 = arith.constant 2 : index
    %c0_6 = arith.constant 0 : index
    %11 = vector.load %arg4[%c2, %c0_6] : memref<16x128xf32, #tpu.memory_space<vmem>>, vector<1x128xf32>
    %12 = vector.broadcast %11 : vector<1x128xf32> to vector<32x128xf32>
    %13 = arith.mulf %2, %12 : vector<32x128xf32>
    %14 = arith.addf %0, %13 : vector<32x128xf32>
    %c3 = arith.constant 3 : index
    %c0_7 = arith.constant 0 : index
    %15 = vector.load %arg4[%c3, %c0_7] : memref<16x128xf32, #tpu.memory_space<vmem>>, vector<1x128xf32>
    %16 = vector.broadcast %15 : vector<1x128xf32> to vector<32x128xf32>
    %17 = arith.mulf %2, %16 : vector<32x128xf32>
    %18 = arith.addf %0, %17 : vector<32x128xf32>
    %c4 = arith.constant 4 : index
    %c0_8 = arith.constant 0 : index
    %19 = vector.load %arg4[%c4, %c0_8] : memref<16x128xf32, #tpu.memory_space<vmem>>, vector<1x128xf32>
    %20 = vector.broadcast %19 : vector<1x128xf32> to vector<32x128xf32>
    %21 = arith.mulf %2, %20 : vector<32x128xf32>
    %22 = arith.addf %0, %21 : vector<32x128xf32>
    %c5 = arith.constant 5 : index
    %c0_9 = arith.constant 0 : index
    %23 = vector.load %arg4[%c5, %c0_9] : memref<16x128xf32, #tpu.memory_space<vmem>>, vector<1x128xf32>
    %24 = vector.broadcast %23 : vector<1x128xf32> to vector<32x128xf32>
    %25 = arith.mulf %2, %24 : vector<32x128xf32>
    %26 = arith.addf %0, %25 : vector<32x128xf32>
    %c0_10 = arith.constant 0 : index
    %c0_11 = arith.constant 0 : index
    %27 = vector.load %arg5[%c0_10, %c0_11] : memref<128x128xf32, #tpu.memory_space<vmem>>, vector<128x128xf32>
    %cst = arith.constant dense<0.000000e+00> : vector<32x128xf32>
    %28 = tpu.matmul %6, %27, %cst {dimension_numbers = #tpu.dot_dimension_numbers<[1], [0], [0], [1], [0, 0, 1, 1], [], []>} : vector<32x128xf32>, vector<128x128xf32>, vector<32x128xf32> -> vector<32x128xf32>
    %c0_12 = arith.constant 0 : index
    %c0_13 = arith.constant 0 : index
    %29 = vector.load %arg6[%c0_12, %c0_13] : memref<128x128xf32, #tpu.memory_space<vmem>>, vector<128x128xf32>
    %cst_14 = arith.constant dense<0.000000e+00> : vector<32x128xf32>
    %30 = tpu.matmul %14, %29, %cst_14 {dimension_numbers = #tpu.dot_dimension_numbers<[1], [0], [0], [1], [0, 0, 1, 1], [], []>} : vector<32x128xf32>, vector<128x128xf32>, vector<32x128xf32> -> vector<32x128xf32>
    %c0_15 = arith.constant 0 : index
    %c0_16 = arith.constant 0 : index
    %31 = vector.load %arg7[%c0_15, %c0_16] : memref<128x128xf32, #tpu.memory_space<vmem>>, vector<128x128xf32>
    %cst_17 = arith.constant dense<0.000000e+00> : vector<32x128xf32>
    %32 = tpu.matmul %18, %31, %cst_17 {dimension_numbers = #tpu.dot_dimension_numbers<[1], [0], [0], [1], [0, 0, 1, 1], [], []>} : vector<32x128xf32>, vector<128x128xf32>, vector<32x128xf32> -> vector<32x128xf32>
    %c8 = arith.constant 8 : index
    %c0_18 = arith.constant 0 : index
    %33 = vector.load %arg4[%c8, %c0_18] : memref<16x128xf32, #tpu.memory_space<vmem>>, vector<1x128xf32>
    %c0_19 = arith.constant 0 : index
    %c0_20 = arith.constant 0 : index
    %34 = vector.load %arg8[%c0_19, %c0_20] : memref<128x64xf32, #tpu.memory_space<vmem>>, vector<128x64xf32>
    %cst_21 = arith.constant dense<0.000000e+00> : vector<32x64xf32>
    %35 = tpu.matmul %10, %34, %cst_21 {dimension_numbers = #tpu.dot_dimension_numbers<[1], [0], [0], [1], [0, 0, 1, 1], [], []>} : vector<32x128xf32>, vector<128x64xf32>, vector<32x64xf32> -> vector<32x64xf32>
    %36 = math.tanh %35 : vector<32x64xf32>
    %c0_22 = arith.constant 0 : index
    %c0_23 = arith.constant 0 : index
    %37 = vector.load %arg9[%c0_22, %c0_23] : memref<64x128xf32, #tpu.memory_space<vmem>>, vector<64x128xf32>
    %cst_24 = arith.constant dense<0.000000e+00> : vector<32x128xf32>
    %38 = tpu.matmul %36, %37, %cst_24 {dimension_numbers = #tpu.dot_dimension_numbers<[1], [0], [0], [1], [0, 0, 1, 1], [], []>} : vector<32x64xf32>, vector<64x128xf32>, vector<32x128xf32> -> vector<32x128xf32>
    %39 = vector.broadcast %33 : vector<1x128xf32> to vector<32x128xf32>
    %40 = arith.addf %39, %38 : vector<32x128xf32>
    %cst_25 = arith.constant 0.000000e+00 : f32
    %41 = vector.broadcast %cst_25 : f32 to vector<32x128xf32>
    %42 = arith.subf %41, %40 : vector<32x128xf32>
    %cst_26 = arith.constant 0.000000e+00 : f32
    %43 = vector.broadcast %cst_26 : f32 to vector<32x128xf32>
    %44 = arith.maximumf %42, %43 : vector<32x128xf32>
    %45 = math.absf %42 : vector<32x128xf32>
    %cst_27 = arith.constant 0.000000e+00 : f32
    %46 = vector.broadcast %cst_27 : f32 to vector<32x128xf32>
    %47 = arith.subf %46, %45 : vector<32x128xf32>
    %48 = math.exp %47 : vector<32x128xf32>
    %cst_28 = arith.constant 1.000000e+00 : f32
    %49 = vector.broadcast %cst_28 : f32 to vector<32x128xf32>
    %50 = arith.addf %49, %48 : vector<32x128xf32>
    %51 = math.log %50 : vector<32x128xf32>
    %52 = arith.addf %44, %51 : vector<32x128xf32>
    %cst_29 = arith.constant 0.000000e+00 : f32
    %53 = vector.broadcast %cst_29 : f32 to vector<32x128xf32>
    %54 = arith.subf %53, %52 : vector<32x128xf32>
    %cst_30 = arith.constant 5.000000e-01 : f32
    %55 = vector.broadcast %cst_30 : f32 to vector<32x128xf32>
    %56 = arith.subf %54, %55 : vector<32x128xf32>
    %57 = math.exp %56 : vector<32x128xf32>
    %cst_31 = arith.constant 0.000000e+00 : f32
    %58 = vector.broadcast %cst_31 : f32 to vector<32x128xf32>
    %59 = arith.subf %58, %57 : vector<32x128xf32>
    %60 = math.exp %59 : vector<32x128xf32>
    %c9 = arith.constant 9 : index
    %c0_32 = arith.constant 0 : index
    %61 = vector.load %arg4[%c9, %c0_32] : memref<16x128xf32, #tpu.memory_space<vmem>>, vector<1x128xf32>
    %c0_33 = arith.constant 0 : index
    %c0_34 = arith.constant 0 : index
    %62 = vector.load %arg10[%c0_33, %c0_34] : memref<128x64xf32, #tpu.memory_space<vmem>>, vector<128x64xf32>
    %cst_35 = arith.constant dense<0.000000e+00> : vector<32x64xf32>
    %63 = tpu.matmul %22, %62, %cst_35 {dimension_numbers = #tpu.dot_dimension_numbers<[1], [0], [0], [1], [0, 0, 1, 1], [], []>} : vector<32x128xf32>, vector<128x64xf32>, vector<32x64xf32> -> vector<32x64xf32>
    %c0_36 = arith.constant 0 : index
    %c0_37 = arith.constant 0 : index
    %64 = vector.load %arg11[%c0_36, %c0_37] : memref<64x128xf32, #tpu.memory_space<vmem>>, vector<64x128xf32>
    %cst_38 = arith.constant dense<0.000000e+00> : vector<32x128xf32>
    %65 = tpu.matmul %63, %64, %cst_38 {dimension_numbers = #tpu.dot_dimension_numbers<[1], [0], [0], [1], [0, 0, 1, 1], [], []>} : vector<32x64xf32>, vector<64x128xf32>, vector<32x128xf32> -> vector<32x128xf32>
    %66 = vector.broadcast %61 : vector<1x128xf32> to vector<32x128xf32>
    %67 = arith.addf %66, %65 : vector<32x128xf32>
    %cst_39 = arith.constant 0.000000e+00 : f32
    %68 = vector.broadcast %cst_39 : f32 to vector<32x128xf32>
    %69 = arith.subf %68, %67 : vector<32x128xf32>
    %70 = math.exp %69 : vector<32x128xf32>
    %cst_40 = arith.constant 1.000000e+00 : f32
    %71 = vector.broadcast %cst_40 : f32 to vector<32x128xf32>
    %72 = arith.addf %71, %70 : vector<32x128xf32>
    %cst_41 = arith.constant 1.000000e+00 : f32
    %73 = vector.broadcast %cst_41 : f32 to vector<32x128xf32>
    %74 = arith.divf %73, %72 : vector<32x128xf32>
    %c0_42 = arith.constant 0 : index
    %c0_43 = arith.constant 0 : index
    %75 = vector.load %arg14[%c0_42, %c0_43] : memref<128x128xf32, #tpu.memory_space<vmem>>, vector<128x128xf32>
    %cst_44 = arith.constant dense<0.000000e+00> : vector<32x128xf32>
    %76 = tpu.matmul %26, %75, %cst_44 {dimension_numbers = #tpu.dot_dimension_numbers<[1], [0], [0], [1], [0, 0, 1, 1], [], []>} : vector<32x128xf32>, vector<128x128xf32>, vector<32x128xf32> -> vector<32x128xf32>
    %cst_45 = arith.constant 0.000000e+00 : f32
    %77 = vector.broadcast %cst_45 : f32 to vector<32x128xf32>
    %78 = arith.subf %77, %76 : vector<32x128xf32>
    %79 = math.exp %78 : vector<32x128xf32>
    %cst_46 = arith.constant 1.000000e+00 : f32
    %80 = vector.broadcast %cst_46 : f32 to vector<32x128xf32>
    %81 = arith.addf %80, %79 : vector<32x128xf32>
    %cst_47 = arith.constant 1.000000e+00 : f32
    %82 = vector.broadcast %cst_47 : f32 to vector<32x128xf32>
    %83 = arith.divf %82, %81 : vector<32x128xf32>
    %c0_48 = arith.constant 0 : index
    %c0_49 = arith.constant 0 : index
    %84 = vector.load %arg15[%c0_48, %c0_49] : memref<128x128xf32, #tpu.memory_space<vmem>>, vector<128x128xf32>
    %cst_50 = arith.constant dense<0.000000e+00> : vector<32x128xf32>
    %85 = tpu.matmul %83, %84, %cst_50 {dimension_numbers = #tpu.dot_dimension_numbers<[1], [0], [0], [1], [0, 0, 1, 1], [], []>} : vector<32x128xf32>, vector<128x128xf32>, vector<32x128xf32> -> vector<32x128xf32>
    %c10 = arith.constant 10 : index
    %c0_51 = arith.constant 0 : index
    %86 = vector.load %arg4[%c10, %c0_51] : memref<16x128xf32, #tpu.memory_space<vmem>>, vector<1x128xf32>
    %c0_52 = arith.constant 0 : index
    %c0_53 = arith.constant 0 : index
    %87 = vector.load %arg12[%c0_52, %c0_53] : memref<128x32xf32, #tpu.memory_space<vmem>>, vector<128x32xf32>
    %cst_54 = arith.constant dense<0.000000e+00> : vector<32x32xf32>
    %88 = tpu.matmul %18, %87, %cst_54 {dimension_numbers = #tpu.dot_dimension_numbers<[1], [0], [0], [1], [0, 0, 1, 1], [], []>} : vector<32x128xf32>, vector<128x32xf32>, vector<32x32xf32> -> vector<32x32xf32>
    %c0_55 = arith.constant 0 : index
    %c0_56 = arith.constant 0 : index
    %89 = vector.load %arg13[%c0_55, %c0_56] : memref<32x128xf32, #tpu.memory_space<vmem>>, vector<32x128xf32>
    %cst_57 = arith.constant dense<0.000000e+00> : vector<32x128xf32>
    %90 = tpu.matmul %88, %89, %cst_57 {dimension_numbers = #tpu.dot_dimension_numbers<[1], [0], [0], [1], [0, 0, 1, 1], [], []>} : vector<32x32xf32>, vector<32x128xf32>, vector<32x128xf32> -> vector<32x128xf32>
    %91 = vector.broadcast %86 : vector<1x128xf32> to vector<32x128xf32>
    %92 = arith.addf %91, %90 : vector<32x128xf32>
    %cst_58 = arith.constant 0.000000e+00 : f32
    %93 = vector.broadcast %cst_58 : f32 to vector<32x128xf32>
    %94 = arith.subf %93, %92 : vector<32x128xf32>
    %95 = math.exp %94 : vector<32x128xf32>
    %cst_59 = arith.constant 1.000000e+00 : f32
    %96 = vector.broadcast %cst_59 : f32 to vector<32x128xf32>
    %97 = arith.addf %96, %95 : vector<32x128xf32>
    %cst_60 = arith.constant 1.000000e+00 : f32
    %98 = vector.broadcast %cst_60 : f32 to vector<32x128xf32>
    %99 = arith.divf %98, %97 : vector<32x128xf32>
    %c0_61 = arith.constant 0 : index
    %c0_62 = arith.constant 0 : index
    %100 = vector.load %arg3[%c0_61, %c0_62] : memref<32x128xf32, #tpu.memory_space<vmem>>, vector<32x128xf32>
    %101 = arith.subf %100, %32 : vector<32x128xf32>
    %102 = arith.mulf %101, %99 : vector<32x128xf32>
    %103 = arith.addf %32, %102 : vector<32x128xf32>
    %104 = tpu.iota {dimensions = array<i32: 0>} : vector<128x2xi32>
    %105 = tpu.iota {dimensions = array<i32: 1>} : vector<128x2xi32>
    %c64_i32 = arith.constant 64 : i32
    %106 = vector.broadcast %c64_i32 : i32 to vector<128x2xi32>
    %107 = arith.muli %105, %106 : vector<128x2xi32>
    %108 = arith.cmpi sge, %104, %107 : vector<128x2xi32>
    %c64_i32_63 = arith.constant 64 : i32
    %109 = vector.broadcast %c64_i32_63 : i32 to vector<128x2xi32>
    %110 = arith.addi %107, %109 : vector<128x2xi32>
    %111 = arith.cmpi slt, %104, %110 : vector<128x2xi32>
    %112 = arith.andi %108, %111 : vector<128x2xi1>
    %cst_64 = arith.constant 1.000000e+00 : f32
    %cst_65 = arith.constant 0.000000e+00 : f32
    %113 = vector.broadcast %cst_64 : f32 to vector<128x2xf32>
    %114 = vector.broadcast %cst_65 : f32 to vector<128x2xf32>
    %115 = arith.select %112, %113, %114 : vector<128x2xi1>, vector<128x2xf32>
    %c6 = arith.constant 6 : index
    %c0_66 = arith.constant 0 : index
    %116 = vector.load %arg4[%c6, %c0_66] : memref<16x128xf32, #tpu.memory_space<vmem>>, vector<1x128xf32>
    %117 = vector.broadcast %116 : vector<1x128xf32> to vector<32x128xf32>
    %118 = arith.mulf %30, %117 : vector<32x128xf32>
    %119 = arith.mulf %118, %118 : vector<32x128xf32>
    %cst_67 = arith.constant dense<0.000000e+00> : vector<32x2xf32>
    %120 = tpu.matmul %119, %115, %cst_67 {dimension_numbers = #tpu.dot_dimension_numbers<[1], [0], [0], [1], [0, 0, 1, 1], [], []>} : vector<32x128xf32>, vector<128x2xf32>, vector<32x2xf32> -> vector<32x2xf32>
    %121 = math.sqrt %120 : vector<32x2xf32>
    %cst_68 = arith.constant 9.99999996E-13 : f32
    %122 = vector.broadcast %cst_68 : f32 to vector<32x2xf32>
    %123 = arith.maximumf %121, %122 : vector<32x2xf32>
    %cst_69 = arith.constant 1.000000e+00 : f32
    %124 = vector.broadcast %cst_69 : f32 to vector<32x2xf32>
    %125 = arith.divf %124, %123 : vector<32x2xf32>
    %cst_70 = arith.constant dense<0.000000e+00> : vector<32x128xf32>
    %126 = tpu.matmul %125, %115, %cst_70 {dimension_numbers = #tpu.dot_dimension_numbers<[1], [1], [0], [0], [0, 0, 1, 0], [], []>} : vector<32x2xf32>, vector<128x2xf32>, vector<32x128xf32> -> vector<32x128xf32>
    %127 = arith.mulf %118, %126 : vector<32x128xf32>
    %c0_71 = arith.constant 0 : index
    %c0_72 = arith.constant 0 : index
    %128 = vector.load %arg16[%c0_71, %c0_72] : memref<32x128xf32, #tpu.memory_space<vmem>>, vector<32x128xf32>
    tpu.vector_store %arg16[%c0_71, %c0_72], %28 {strides = array<i32>} : memref<32x128xf32, #tpu.memory_space<vmem>>, vector<32x128xf32>,
    %c0_73 = arith.constant 0 : index
    %c0_74 = arith.constant 0 : index
    %129 = vector.load %arg17[%c0_73, %c0_74] : memref<32x128xf32, #tpu.memory_space<vmem>>, vector<32x128xf32>
    tpu.vector_store %arg17[%c0_73, %c0_74], %60 {strides = array<i32>} : memref<32x128xf32, #tpu.memory_space<vmem>>, vector<32x128xf32>,
    %cst_75 = arith.constant 1.000000e+00 : f32
    %130 = vector.broadcast %cst_75 : f32 to vector<32x128xf32>
    %131 = arith.subf %74, %130 : vector<32x128xf32>
    %c7 = arith.constant 7 : index
    %c0_76 = arith.constant 0 : index
    %132 = vector.load %arg4[%c7, %c0_76] : memref<16x128xf32, #tpu.memory_space<vmem>>, vector<1x128xf32>
    %133 = vector.broadcast %132 : vector<1x128xf32> to vector<32x128xf32>
    %134 = arith.mulf %131, %133 : vector<32x128xf32>
    %cst_77 = arith.constant 1.000000e+00 : f32
    %135 = vector.broadcast %cst_77 : f32 to vector<32x128xf32>
    %136 = arith.addf %135, %134 : vector<32x128xf32>
    %137 = arith.mulf %30, %136 : vector<32x128xf32>
    %c0_78 = arith.constant 0 : index
    %c0_79 = arith.constant 0 : index
    %138 = vector.load %arg18[%c0_78, %c0_79] : memref<32x128xf32, #tpu.memory_space<vmem>>, vector<32x128xf32>
    tpu.vector_store %arg18[%c0_78, %c0_79], %137 {strides = array<i32>} : memref<32x128xf32, #tpu.memory_space<vmem>>, vector<32x128xf32>,
    %c0_80 = arith.constant 0 : index
    %c0_81 = arith.constant 0 : index
    %139 = vector.load %arg19[%c0_80, %c0_81] : memref<32x128xf32, #tpu.memory_space<vmem>>, vector<32x128xf32>
    tpu.vector_store %arg19[%c0_80, %c0_81], %103 {strides = array<i32>} : memref<32x128xf32, #tpu.memory_space<vmem>>, vector<32x128xf32>,
    %cst_82 = arith.constant 0.000000e+00 : f32
    %140 = vector.broadcast %cst_82 : f32 to vector<32x128xf32>
    %141 = arith.subf %140, %127 : vector<32x128xf32>
    %c0_83 = arith.constant 0 : index
    %c0_84 = arith.constant 0 : index
    %142 = vector.load %arg20[%c0_83, %c0_84] : memref<32x128xf32, #tpu.memory_space<vmem>>, vector<32x128xf32>
    tpu.vector_store %arg20[%c0_83, %c0_84], %141 {strides = array<i32>} : memref<32x128xf32, #tpu.memory_space<vmem>>, vector<32x128xf32>,
    %143 = arith.mulf %127, %74 : vector<32x128xf32>
    %c0_85 = arith.constant 0 : index
    %c0_86 = arith.constant 0 : index
    %144 = vector.load %arg21[%c0_85, %c0_86] : memref<32x128xf32, #tpu.memory_space<vmem>>, vector<32x128xf32>
    tpu.vector_store %arg21[%c0_85, %c0_86], %143 {strides = array<i32>} : memref<32x128xf32, #tpu.memory_space<vmem>>, vector<32x128xf32>,
    %c0_87 = arith.constant 0 : index
    %c0_88 = arith.constant 0 : index
    %145 = vector.load %arg22[%c0_87, %c0_88] : memref<32x128xf32, #tpu.memory_space<vmem>>, vector<32x128xf32>
    tpu.vector_store %arg22[%c0_87, %c0_88], %85 {strides = array<i32>} : memref<32x128xf32, #tpu.memory_space<vmem>>, vector<32x128xf32>,
    return
  }
  func.func @transform_0(%arg0: i32) -> (i32, i32) {
    %c0_i32 = arith.constant 0 : i32
    %c0_i32_0 = arith.constant 0 : i32
    return %arg0, %c0_i32 : i32, i32
  }
  func.func @transform_1(%arg0: i32) -> (i32, i32) {
    %c0_i32 = arith.constant 0 : i32
    %c0_i32_0 = arith.constant 0 : i32
    return %arg0, %c0_i32 : i32, i32
  }
  func.func @transform_2(%arg0: i32) -> (i32, i32) {
    %c0_i32 = arith.constant 0 : i32
    %c0_i32_0 = arith.constant 0 : i32
    return %arg0, %c0_i32 : i32, i32
  }
  func.func @transform_3(%arg0: i32) -> (i32, i32) {
    %c0_i32 = arith.constant 0 : i32
    %c0_i32_0 = arith.constant 0 : i32
    %c0_i32_1 = arith.constant 0 : i32
    return %c0_i32, %c0_i32_0 : i32, i32
  }
  func.func @transform_4(%arg0: i32) -> (i32, i32) {
    %c0_i32 = arith.constant 0 : i32
    %c0_i32_0 = arith.constant 0 : i32
    %c0_i32_1 = arith.constant 0 : i32
    return %c0_i32, %c0_i32_0 : i32, i32
  }
  func.func @transform_5(%arg0: i32) -> (i32, i32) {
    %c0_i32 = arith.constant 0 : i32
    %c0_i32_0 = arith.constant 0 : i32
    %c0_i32_1 = arith.constant 0 : i32
    return %c0_i32, %c0_i32_0 : i32, i32
  }
  func.func @transform_6(%arg0: i32) -> (i32, i32) {
    %c0_i32 = arith.constant 0 : i32
    %c0_i32_0 = arith.constant 0 : i32
    %c0_i32_1 = arith.constant 0 : i32
    return %c0_i32, %c0_i32_0 : i32, i32
  }
  func.func @transform_7(%arg0: i32) -> (i32, i32) {
    %c0_i32 = arith.constant 0 : i32
    %c0_i32_0 = arith.constant 0 : i32
    %c0_i32_1 = arith.constant 0 : i32
    return %c0_i32, %c0_i32_0 : i32, i32
  }
  func.func @transform_8(%arg0: i32) -> (i32, i32) {
    %c0_i32 = arith.constant 0 : i32
    %c0_i32_0 = arith.constant 0 : i32
    %c0_i32_1 = arith.constant 0 : i32
    return %c0_i32, %c0_i32_0 : i32, i32
  }
  func.func @transform_9(%arg0: i32) -> (i32, i32) {
    %c0_i32 = arith.constant 0 : i32
    %c0_i32_0 = arith.constant 0 : i32
    %c0_i32_1 = arith.constant 0 : i32
    return %c0_i32, %c0_i32_0 : i32, i32
  }
  func.func @transform_10(%arg0: i32) -> (i32, i32) {
    %c0_i32 = arith.constant 0 : i32
    %c0_i32_0 = arith.constant 0 : i32
    %c0_i32_1 = arith.constant 0 : i32
    return %c0_i32, %c0_i32_0 : i32, i32
  }
  func.func @transform_11(%arg0: i32) -> (i32, i32) {
    %c0_i32 = arith.constant 0 : i32
    %c0_i32_0 = arith.constant 0 : i32
    %c0_i32_1 = arith.constant 0 : i32
    return %c0_i32, %c0_i32_0 : i32, i32
  }
  func.func @transform_12(%arg0: i32) -> (i32, i32) {
    %c0_i32 = arith.constant 0 : i32
    %c0_i32_0 = arith.constant 0 : i32
    %c0_i32_1 = arith.constant 0 : i32
    return %c0_i32, %c0_i32_0 : i32, i32
  }
  func.func @transform_13(%arg0: i32) -> (i32, i32) {
    %c0_i32 = arith.constant 0 : i32
    %c0_i32_0 = arith.constant 0 : i32
    %c0_i32_1 = arith.constant 0 : i32
    return %c0_i32, %c0_i32_0 : i32, i32
  }
  func.func @transform_14(%arg0: i32) -> (i32, i32) {
    %c0_i32 = arith.constant 0 : i32
    %c0_i32_0 = arith.constant 0 : i32
    %c0_i32_1 = arith.constant 0 : i32
    return %c0_i32, %c0_i32_0 : i32, i32
  }
  func.func @transform_15(%arg0: i32) -> (i32, i32) {
    %c0_i32 = arith.constant 0 : i32
    %c0_i32_0 = arith.constant 0 : i32
    return %arg0, %c0_i32 : i32, i32
  }
  func.func @transform_16(%arg0: i32) -> (i32, i32) {
    %c0_i32 = arith.constant 0 : i32
    %c0_i32_0 = arith.constant 0 : i32
    return %arg0, %c0_i32 : i32, i32
  }
  func.func @transform_17(%arg0: i32) -> (i32, i32) {
    %c0_i32 = arith.constant 0 : i32
    %c0_i32_0 = arith.constant 0 : i32
    return %arg0, %c0_i32 : i32, i32
  }
  func.func @transform_18(%arg0: i32) -> (i32, i32) {
    %c0_i32 = arith.constant 0 : i32
    %c0_i32_0 = arith.constant 0 : i32
    return %arg0, %c0_i32 : i32, i32
  }
  func.func @transform_19(%arg0: i32) -> (i32, i32) {
    %c0_i32 = arith.constant 0 : i32
    %c0_i32_0 = arith.constant 0 : i32
    return %arg0, %c0_i32 : i32, i32
  }
  func.func @transform_20(%arg0: i32) -> (i32, i32) {
    %c0_i32 = arith.constant 0 : i32
    %c0_i32_0 = arith.constant 0 : i32
    return %arg0, %c0_i32 : i32, i32
  }
  func.func @transform_21(%arg0: i32) -> (i32, i32) {
    %c0_i32 = arith.constant 0 : i32
    %c0_i32_0 = arith.constant 0 : i32
    return %arg0, %c0_i32 : i32, i32
  }
}

</mosaic_0001>

<bundles_post_ra>
// kernel: tpu_custom_call.1
= control target key start
LH: loop header
LB: loop body
LE: loop exit
PB: predicated region body
PF: predicated region fallthrough
CT: control target
= control target key end

     0   :  { %s3346_s0 = inlined_call_operand.hbm [shape: f32[32,128], index: 0, kind: input, shape index: {}]   ;;  %s3347_s1 = inlined_call_operand.hbm [shape: f32[32,128], index: 1, kind: input, shape index: {}]   ;;  %s3348_s2 = inlined_call_operand.hbm [shape: f32[32,128], index: 2, kind: input, shape index: {}]   ;;  %s3349_s3 = inlined_call_operand.hbm [shape: f32[16,128], index: 3, kind: input, shape index: {}]   ;;  %s3350_s4 = inlined_call_operand.vmem [shape: f32[128,128], index: 4, kind: input, shape index: {}]   ;;  %s3351_s5 = inlined_call_operand.vmem [shape: f32[128,128], index: 5, kind: input, shape index: {}]   ;;  %s3352_s6 = inlined_call_operand.vmem [shape: f32[128,128], index: 6, kind: input, shape index: {}]   ;;  %s3353_s7 = inlined_call_operand.vmem [shape: f32[128,64], index: 7, kind: input, shape index: {}]   ;;  %s3354_s8 = inlined_call_operand.vmem [shape: f32[64,128], index: 8, kind: input, shape index: {}]   ;;  %s3355_s9 = inlined_call_operand.vmem [shape: f32[128,64], index: 9, kind: input, shape index: {}]   ;;  %s3356_s10 = inlined_call_operand.hbm [shape: f32[64,128], index: 10, kind: input, shape index: {}]   ;;  %s3357_s11 = inlined_call_operand.vmem [shape: f32[128,32], index: 11, kind: input, shape index: {}]   ;;  %s3358_s12 = inlined_call_operand.hbm [shape: f32[32,128], index: 12, kind: input, shape index: {}]   ;;  %s3359_s13 = inlined_call_operand.hbm [shape: f32[128,128], index: 13, kind: input, shape index: {}]   ;;  %s3360_s14 = inlined_call_operand.hbm [shape: f32[128,128], index: 14, kind: input, shape index: {}]   ;;  %s3361_s15 = inlined_call_operand.hbm [shape: f32[32,128], index: 15, kind: output, shape index: {0}]   ;;  %s3362_s16 = inlined_call_operand.hbm [shape: f32[32,128], index: 16, kind: output, shape index: {1}]   ;;  %s3363_s17 = inlined_call_operand.hbm [shape: f32[32,128], index: 17, kind: output, shape index: {2}]   ;;  %s3364_s18 = inlined_call_operand.hbm [shape: f32[32,128], index: 18, kind: output, shape index: {3}]   ;;  %s3365_s19 = inlined_call_operand.hbm [shape: f32[32,128], index: 19, kind: output, shape index: {4}]   ;;  %s3366_s20 = inlined_call_operand.hbm [shape: f32[32,128], index: 20, kind: output, shape index: {5}]   ;;  %s3367_s21 = inlined_call_operand.hbm [shape: f32[32,128], index: 21, kind: output, shape index: {6}]  }
   0x1   :  { %3374 = sst [smem:[#allocation35_spill]] %s3346_s0 }
   0x2   :  { %3375 = sst [smem:[#allocation36_spill]] %s3347_s1 }
   0x3   :  { %3376 = sst [smem:[#allocation37_spill]] %s3348_s2 }
   0x4   :  { %3377 = sst [smem:[#allocation38_spill]] %s3349_s3 }
   0x5   :  { %3378 = sst [smem:[#allocation39_spill]] %s3350_s4 }
   0x6   :  { %3379 = sst [smem:[#allocation40_spill]] %s3351_s5 }
   0x7   :  { %3380 = sst [smem:[#allocation41_spill]] %s3365_s19 }
   0x8   :  { %27 = vsyncpa [#allocation3], 0 }
   0x9   :  { %28 = vsyncpa [#allocation6], 0 }
   0xa   :  { %29 = vsyncpa [#allocation9], 0 }
   0xb   :  { %30 = vsyncpa [#allocation12], 0 }
   0xc   :  { %31 = vsyncpa [#allocation15], 0 }
   0xd   :  { %32 = vsyncpa [#allocation4], 0 }
   0xe   :  { %33 = vsyncpa [#allocation18], 0 }
   0xf   :  { %34 = vsyncpa [#allocation21], 0 }
  0x10   :  { %35 = vsyncpa [#allocation24], 0  ;;  %s3381_s26 = sld [smem:[#allocation36_spill]]  ;;  %s2193_s3 = smov [#allocation5]  }
  0x11   :  { %s55_s28 = sshll.u32 %s2193_s3, 4  ;;  %s3382_s4 = sld [smem:[#allocation38_spill]]  ;;  %s56_s28 = int_to_ptr.vmem [resolvable:$true] %s55_s28 }
  0x12   :  { %s2194_s5 = smov 128   ;;  %s2195_s22 = smov 8  }
  0x13   :  { %s2196_s23 = smov [#allocation8]   ;;  %s119_s25 = sshll.u32 %s3358_s12, 4  ;;  %s120_s25 = int_to_ptr.hbm [resolvable:$true] %s119_s25 }
  0x14   :  { %s81_s1 = sshll.u32 %s2196_s23, 4  ;;  %s3383_s29 = sld [smem:[#allocation35_spill]]  ;;  %s82_s1 = int_to_ptr.vmem [resolvable:$true] %s81_s1 }
  0x15   :  { %s3384_s24 = sld [smem:[#allocation37_spill]]  ;;  %s2199_s3 = smov [#allocation7]  }
  0x16   :  { %s53_s27 = sshll.u32 %s3381_s26, 4  ;;  %s104_s26 = sshll.u32 %s3356_s10, 4  ;;  %s54_s27 = int_to_ptr.hbm [resolvable:$true] %s53_s27  ;;  %s105_s26 = int_to_ptr.hbm [resolvable:$true] %s104_s26 }
  0x17   :  { %s79_s30 = sshll.u32 %s3382_s4, 4  ;;  %s2197_s4 = smov [#allocation11]   ;;  %s80_s30 = int_to_ptr.hbm [resolvable:$true] %s79_s30 }
  0x18   :  { %61 = dma.hbm_to_vmem [thread:$0]  %s54_s27, 512, %s56_s28, [#allocation6], %s2194_s5, %s2194_s5, %s2195_s22  }
  0x19   :  { %87 = dma.hbm_to_vmem [thread:$0]  %s80_s30, 256, %s82_s1, [#allocation9], %s2194_s5, %s2194_s5, %s2195_s22  }
  0x1a   :  { %s40_s0 = sshll.u32 %s3383_s29, 4  ;;  %s121_s19 = sshll.u32 %s2197_s4, 4  ;;  %s41_s0 = int_to_ptr.hbm [resolvable:$true] %s40_s0  ;;  %s122_s19 = int_to_ptr.vmem [resolvable:$true] %s121_s19 }
  0x1b   :  { %127 = dma.hbm_to_vmem [thread:$0]  %s120_s25, 512, %s122_s19, [#allocation12], %s2194_s5, %s2194_s5, %s2195_s22  }
  0x1c   :  { %s2198_s27 = smov [#allocation2]   ;;  %s66_s2 = sshll.u32 %s3384_s24, 4  ;;  %s67_s2 = int_to_ptr.hbm [resolvable:$true] %s66_s2 }
  0x1d   :  { %s42_s12 = sshll.u32 %s2198_s27, 4  ;;  %s68_s29 = sshll.u32 %s2199_s3, 4  ;;  %s43_s12 = int_to_ptr.vmem [resolvable:$true] %s42_s12  ;;  %s69_s29 = int_to_ptr.vmem [resolvable:$true] %s68_s29 }
  0x1e   :  { %48 = dma.hbm_to_vmem [thread:$0]  %s41_s0, 512, %s43_s12, [#allocation3], %s2194_s5, %s2194_s5, %s2195_s22  }
  0x1f   :  { %74 = dma.hbm_to_vmem [thread:$0]  %s67_s2, 512, %s69_s29, [#allocation6], %s2194_s5, %s2194_s5, %s2195_s22  }
  0x20   :  { %s2200_s19 = smov [#allocation10]   ;;  %s132_s28 = sshll.u32 %s3359_s13, 4  ;;  %s133_s28 = int_to_ptr.hbm [resolvable:$true] %s132_s28 }
  0x21   :  { %s106_s25 = sshll.u32 %s2200_s19, 4  ;;  %s145_s12 = sshll.u32 %s3360_s14, 4  ;;  %s107_s25 = int_to_ptr.vmem [resolvable:$true] %s106_s25  ;;  %s146_s12 = int_to_ptr.hbm [resolvable:$true] %s145_s12 }
  0x22   :  { %112 = dma.hbm_to_vmem [thread:$0]  %s105_s26, 1024, %s107_s25, [#allocation9], %s2194_s5, %s2194_s5, %s2195_s22  }
  0x23   :  { %s2201_s23 = smov [#allocation13]   ;;  %s2202_s2 = smov [#allocation14]  }
  0x24   :  { %s134_s24 = sshll.u32 %s2201_s23, 4  ;;  %s147_s13 = sshll.u32 %s2202_s2, 4  ;;  %s135_s24 = int_to_ptr.vmem [resolvable:$true] %s134_s24  ;;  %s148_s13 = int_to_ptr.vmem [resolvable:$true] %s147_s13 }
  0x25   :  { %140 = dma.hbm_to_vmem [thread:$0]  %s133_s28, 2048, %s135_s24, [#allocation12], %s2194_s5, %s2194_s5, %s2195_s22  }
  0x26   :  { %153 = dma.hbm_to_vmem [thread:$0]  %s146_s12, 2048, %s148_s13, [#allocation15], %s2194_s5, %s2194_s5, %s2195_s22  }
  0x27   :  { %2175 = dma.done.wait [#allocation3], 512  }
  0x28   :  { %2176 = vsyncadd [#allocation3], 4294966784 }
  0x29   :  { %2177 = dma.done.wait [#allocation6], 1024  }
  0x2a   :  { %2178 = vsyncadd [#allocation6], 4294966272 }
  0x2b   :  { %2179 = dma.done.wait [#allocation9], 1280  }
  0x2c   :  { %2180 = vsyncadd [#allocation9], 4294966016 }
  0x2d   :  { %2181 = dma.done.wait [#allocation12], 2560  }
  0x2e   :  { %2182 = vsyncadd [#allocation12], 4294964736 }
  0x2f   :  { %2183 = dma.done.wait [#allocation15], 2048  }
  0x30   :  { %2184 = vsyncadd [#allocation15], 4294965248  ;;  %s3385_s1 = sld [smem:[#allocation39_spill]]  ;;  %v2400_v10 = vld [vmem:[#allocation2] sm:$0xff]  ;;  %v2418_v19 = vld [vmem:[#allocation2 + $0x8] sm:$0xff]  ;;  %s2205_s3 = smov [#allocation16]  }
  0x31   :  { %v190_v11 = vld [vmem:[#allocation5] sm:$0xff]  ;;  %v191_v20 = vld [vmem:[#allocation5 + $0x8] sm:$0xff]  ;;  %s3386_s14 = sld [smem:[#allocation40_spill]]  ;;  %v2437_v28 = vld [vmem:[#allocation2 + $0x10] sm:$0xff]  ;;  %s1485_s29 = sshll.u32 %s2205_s3, 4  ;;  %s1486_s29 = int_to_ptr.vmem [resolvable:$true] %s1485_s29 }
  0x32   :  { %v2409_v14 = vsub.f32 %v190_v11, %v2400_v10  ;;  %v1700_v15 = vld [vmem:[#allocation8] ss:$0 sm:$0xff]  ;;  %v2428_v24 = vsub.f32 %v191_v20, %v2418_v19  ;;  %v192_v29 = vld [vmem:[#allocation5 + $0x10] sm:$0xff]  ;;  %v2456_v37 = vld [vmem:[#allocation2 + $0x18] sm:$0xff]  ;;  %s2207_s4 = smov [#allocation19]   ;;  %s1513_s10 = sshll.u32 %s3363_s17, 4  ;;  %s1514_s10 = int_to_ptr.hbm [resolvable:$true] %s1513_s10 }
  0x33   :  { %v2447_v33 = vsub.f32 %v192_v29, %v2437_v28  ;;  %v193_v38 = vld [vmem:[#allocation5 + $0x18] sm:$0xff]  ;;  %v1701_v49 = vld [vmem:[#allocation8 + $0x2] ss:$0 sm:$0xff]  ;;  %v581_v57 = vld [vmem:[%s3355_s9 + $0x70] sm:$0xff]  ;;  %s1511_s27 = sshll.u32 %s2207_s4, 4  ;;  %s1552_s23 = sshll.u32 %s3366_s20, 4  ;;  %s1512_s27 = int_to_ptr.vmem [resolvable:$true] %s1511_s27  ;;  %s1553_s23 = int_to_ptr.hbm [resolvable:$true] %s1552_s23 }
  0x34   :  { %v200_v18 = vmul.f32 %v1700_v15, %v2409_v14  ;;  %v201_v27 = vmul.f32 %v1700_v15, %v2428_v24  ;;  %v2466_v42 = vsub.f32 %v193_v38, %v2456_v37  ;;  %v220_v52 = vmul.f32 %v1701_v49, %v2409_v14  ;;  %v582_v56 = vld [vmem:[%s3355_s9 + $0x78] sm:$0xff]  ;;  %v408_v60 = vld [vmem:[%s3353_s7 + $0x70] sm:$0xff]  ;;  %v580_v61 = vld [vmem:[%s3355_s9 + $0x68] sm:$0xff]  ;;  %s2209_s24 = smov [#allocation25]   ;;  %s1565_s30 = sshll.u32 %s3367_s21, 4  ;;  %s1566_s30 = int_to_ptr.hbm [resolvable:$true] %s1565_s30 }
  0x35   :  { %v202_v36 = vmul.f32 %v1700_v15, %v2447_v33  ;;  %v221_v58 = vmul.f32 %v1701_v49, %v2428_v24  ;;  %v409_v59 = vld [vmem:[%s3353_s7 + $0x78] sm:$0xff]  ;;  %v407_v62 = vld [vmem:[%s3353_s7 + $0x68] sm:$0xff]  ;;  %v579_v63 = vld [vmem:[%s3355_s9 + $0x60] sm:$0xff]  ;;  %s1563_s2 = sshll.u32 %s2209_s24, 4  ;;  %s2210_s20 = smov [#allocation20]   ;;  %s1564_s2 = int_to_ptr.vmem [resolvable:$true] %s1563_s2 }
  0x36   :  { %v273_v0 = vld [vmem:[%s3385_s1 + $0x78] sm:$0xff]  ;;  %v272_v1 = vld [vmem:[%s3385_s1 + $0x70] sm:$0xff]  ;;  %v271_v2 = vld [vmem:[%s3385_s1 + $0x68] sm:$0xff]  ;;  %v204_v23 = vadd.f32 %v200_v18, %v2400_v10  ;;  %v205_v32 = vadd.f32 %v201_v27, %v2418_v19  ;;  %v203_v45 = vmul.f32 %v1700_v15, %v2466_v42  ;;  %v224_v55 = vadd.f32 %v220_v52, %v2400_v10  ;;  %410 = vmatpush.msra.mxu3 %v409_v59  ;;  %s1524_s21 = sshll.u32 %s2210_s20, 4  ;;  %s1525_s21 = int_to_ptr.vmem [resolvable:$true] %s1524_s21 }
  0x37   :  { %274 = vmatpush.msra.mxu1 %v273_v0  ;;  %v270_v3 = vld [vmem:[%s3385_s1 + $0x60] sm:$0xff]  ;;  %v269_v4 = vld [vmem:[%s3385_s1 + $0x58] sm:$0xff]  ;;  %v268_v5 = vld [vmem:[%s3385_s1 + $0x50] sm:$0xff]  ;;  %v206_v41 = vadd.f32 %v202_v36, %v2437_v28  ;;  %v225_v0 = vadd.f32 %v221_v58, %v2418_v19  ;;  %v223_v15 = vmul.f32 %v1701_v49, %v2466_v42 }
  0x38   :  { %v267_v6 = vld [vmem:[%s3385_s1 + $0x48] sm:$0xff]  ;;  %v266_v7 = vld [vmem:[%s3385_s1 + $0x40] sm:$0xff]  ;;  %v265_v8 = vld [vmem:[%s3385_s1 + $0x38] sm:$0xff]  ;;  %v207_v48 = vadd.f32 %v203_v45, %v2456_v37  ;;  %411 = vmatpush.msra.mxu3 %v408_v60 }
  0x39   :  { %275 = vmatpush.msra.mxu1 %v272_v1  ;;  %v264_v9 = vld [vmem:[%s3385_s1 + $0x30] sm:$0xff]  ;;  %v263_v12 = vld [vmem:[%s3385_s1 + $0x28] sm:$0xff]  ;;  %v262_v13 = vld [vmem:[%s3385_s1 + $0x20] sm:$0xff] }
  0x3a   :  { %v261_v16 = vld [vmem:[%s3385_s1 + $0x18] sm:$0xff]  ;;  %v260_v17 = vld [vmem:[%s3385_s1 + $0x10] sm:$0xff]  ;;  %v259_v21 = vld [vmem:[%s3385_s1 + $0x8] sm:$0xff]  ;;  %412 = vmatpush.msra.mxu3 %v407_v62 }
  0x3b   :  { %276 = vmatpush.msra.mxu1 %v271_v2  ;;  %v258_v22 = vld [vmem:[%s3385_s1] sm:$0xff]  ;;  %v318_v25 = vld [vmem:[%s3386_s14 + $0x78] sm:$0xff]  ;;  %v317_v26 = vld [vmem:[%s3386_s14 + $0x70] sm:$0xff]  ;;  %s1487_s1 = sshll.u32 %s3361_s15, 4  ;;  %s2206_s15 = smov [#allocation17]   ;;  %s1488_s1 = int_to_ptr.hbm [resolvable:$true] %s1487_s1 }
  0x3c   :  { %v316_v30 = vld [vmem:[%s3386_s14 + $0x68] sm:$0xff]  ;;  %v315_v31 = vld [vmem:[%s3386_s14 + $0x60] sm:$0xff]  ;;  %v314_v34 = vld [vmem:[%s3386_s14 + $0x58] sm:$0xff]  ;;  %s1498_s19 = sshll.u32 %s2206_s15, 4  ;;  %s1499_s19 = int_to_ptr.vmem [resolvable:$true] %s1498_s19 }
  0x3d   :  { %277 = vmatpush.msra.mxu1 %v270_v3  ;;  %v313_v35 = vld [vmem:[%s3386_s14 + $0x50] sm:$0xff]  ;;  %v312_v39 = vld [vmem:[%s3386_s14 + $0x48] sm:$0xff]  ;;  %v311_v40 = vld [vmem:[%s3386_s14 + $0x40] sm:$0xff]  ;;  %v222_v3 = vmul.f32 %v1701_v49, %v2447_v33 }
  0x3e   :  { %v310_v43 = vld [vmem:[%s3386_s14 + $0x38] sm:$0xff]  ;;  %v309_v44 = vld [vmem:[%s3386_s14 + $0x30] sm:$0xff]  ;;  %v308_v46 = vld [vmem:[%s3386_s14 + $0x28] sm:$0xff] }
  0x3f   :  { %278 = vmatpush.msra.mxu1 %v269_v4  ;;  %v307_v47 = vld [vmem:[%s3386_s14 + $0x20] sm:$0xff]  ;;  %v306_v50 = vld [vmem:[%s3386_s14 + $0x18] sm:$0xff]  ;;  %v305_v51 = vld [vmem:[%s3386_s14 + $0x10] sm:$0xff] }
  0x40   :  { %v304_v53 = vld [vmem:[%s3386_s14 + $0x8] sm:$0xff]  ;;  %v303_v54 = vld [vmem:[%s3386_s14] sm:$0xff]  ;;  %v578_v1 = vld [vmem:[%s3355_s9 + $0x58] sm:$0xff]  ;;  %s1526_s14 = sshll.u32 %s3364_s18, 4  ;;  %s1527_s14 = int_to_ptr.hbm [resolvable:$true] %s1526_s14 }
  0x41   :  { %279 = vmatpush.msra.mxu1 %v268_v5  ;;  %v577_v2 = vld [vmem:[%s3355_s9 + $0x50] sm:$0xff]  ;;  %v406_v4 = vld [vmem:[%s3353_s7 + $0x60] sm:$0xff]  ;;  %v405_v5 = vld [vmem:[%s3353_s7 + $0x58] sm:$0xff] }
  0x42   :  { %413 = vmatpush.msra.mxu3 %v406_v4  ;;  %v403_v11 = vld [vmem:[%s3353_s7 + $0x48] sm:$0xff]  ;;  %v400_v20 = vld [vmem:[%s3353_s7 + $0x30] sm:$0xff]  ;;  %v567_v36 = vld [vmem:[%s3355_s9] sm:$0xff] }
  0x43   :  { %280 = vmatpush.msra.mxu1 %v267_v6  ;;  %v576_v6 = vld [vmem:[%s3355_s9 + $0x48] sm:$0xff]  ;;  %v569_v27 = vld [vmem:[%s3355_s9 + $0x10] sm:$0xff]  ;;  %v756_v49 = vld [vmem:[#allocation13 + $0x70] sm:$0xff] }
  0x44   :  { %414 = vmatpush.msra.mxu3 %v405_v5  ;;  %v572_v18 = vld [vmem:[%s3355_s9 + $0x28] sm:$0xff]  ;;  %v2633_v52 = vld [vmem:[%s3357_s11 + $0x60] sm:$0xff]  ;;  %v2648_v58 = vld [vmem:[%s3357_s11 + $0x50] sm:$0xff] }
  0x45   :  { %281 = vmatpush.msra.mxu1 %v266_v7  ;;  %v404_v7 = vld [vmem:[%s3353_s7 + $0x50] sm:$0xff]  ;;  %v753_v59 = vld [vmem:[#allocation13 + $0x58] sm:$0xff] }
  0x46   :  { %415 = vmatpush.msra.mxu3 %v404_v7  ;;  %v2654_v60 = vld [vmem:[%s3357_s11 + $0x48] sm:$0xff] }
  0x47   :  { %282 = vmatpush.msra.mxu1 %v265_v8  ;;  %v575_v8 = vld [vmem:[%s3355_s9 + $0x40] sm:$0xff]  ;;  %v749_v7 = vld [vmem:[#allocation13 + $0x38] sm:$0xff] }
  0x48   :  { %416 = vmatpush.msra.mxu3 %v403_v11 }
  0x49   :  { %283 = vmatpush.msra.mxu1 %v264_v9  ;;  %v226_v9 = vadd.f32 %v222_v3, %v2437_v28  ;;  %v750_v3 = vld [vmem:[#allocation13 + $0x40] sm:$0xff] }
  0x4b   :  { %284 = vmatpush.msra.mxu1 %v263_v12  ;;  %v574_v12 = vld [vmem:[%s3355_s9 + $0x38] sm:$0xff] }
  0x4d   :  { %285 = vmatpush.msra.mxu1 %v262_v13  ;;  %v573_v13 = vld [vmem:[%s3355_s9 + $0x30] sm:$0xff] }
  0x4f   :  { %286 = vmatpush.msra.mxu1 %v261_v16  ;;  %v402_v16 = vld [vmem:[%s3353_s7 + $0x40] sm:$0xff] }
  0x50   :  { %417 = vmatpush.msra.mxu3 %v402_v16  ;;  %v747_v16 = vld [vmem:[#allocation13 + $0x28] sm:$0xff] }
  0x51   :  { %287 = vmatpush.msra.mxu1 %v260_v17  ;;  %v401_v17 = vld [vmem:[%s3353_s7 + $0x38] sm:$0xff] }
  0x52   :  { %418 = vmatpush.msra.mxu3 %v401_v17  ;;  %v2701_v17 = vld [vmem:[%s3357_s11 + $0x18] sm:$0xff] }
  0x53   :  { %288 = vmatpush.msra.mxu1 %v259_v21  ;;  %v571_v21 = vld [vmem:[%s3355_s9 + $0x20] sm:$0xff] }
  0x54   :  { %419 = vmatpush.msra.mxu3 %v400_v20 }
  0x55   :  { %289 = vmatpush.msra.mxu1 %v258_v22  ;;  %v227_v22 = vadd.f32 %v223_v15, %v2456_v37  ;;  %v2695_v15 = vld [vmem:[#allocation8 + $0x3] ss:$0 sm:$0xff] }
  0x56   :  { %290 = vmatmul.f32.vlgmr.msra.gmra.mxu1 %v204_v23  ;;  %v2568_v23 = vld [vmem:[#allocation8 + $0x4] ss:$0 sm:$0xff] }
  0x57   :  { %319 = vmatpush.msrb.mxu1 %v318_v25  ;;  %v399_v25 = vld [vmem:[%s3353_s7 + $0x28] sm:$0xff]  ;;  %v240_v29 = vmul.f32 %v2568_v23, %v2409_v14  ;;  %v241_v45 = vmul.f32 %v2568_v23, %v2428_v24  ;;  %v243_v5 = vmul.f32 %v2568_v23, %v2466_v42 }
  0x58   :  { %420 = vmatpush.msra.mxu3 %v399_v25  ;;  %v1097_v25 = vlaneseq }
  0x59   :  { %320 = vmatpush.msrb.mxu1 %v317_v26  ;;  %v570_v26 = vld [vmem:[%s3355_s9 + $0x18] sm:$0xff]  ;;  %v244_v38 = vadd.f32 %v240_v29, %v2400_v10  ;;  %v2722_v29 = vld [vmem:[%s3357_s11] sm:$0xff] }
  0x5b   :  { %321 = vmatpush.msrb.mxu1 %v316_v30  ;;  %v398_v30 = vld [vmem:[%s3353_s7 + $0x20] sm:$0xff] }
  0x5c   :  { %421 = vmatpush.msra.mxu3 %v398_v30 }
  0x5d   :  { %322 = vmatpush.msrb.mxu1 %v315_v31  ;;  %v397_v31 = vld [vmem:[%s3353_s7 + $0x18] sm:$0xff] }
  0x5e   :  { %293 = vmatmul.f32.gmra.mxu1 %v205_v32  ;;  %v568_v32 = vld [vmem:[%s3355_s9 + $0x8] sm:$0xff]  ;;  %422 = vmatpush.msra.mxu3 %v397_v31  ;;  %v744_v31 = vld [vmem:[#allocation13 + $0x10] sm:$0xff]  ;;  %s1500_s9 = sshll.u32 %s3362_s16, 4  ;;  %s2208_s16 = smov [#allocation23]   ;;  %s1501_s9 = int_to_ptr.hbm [resolvable:$true] %s1500_s9 }
  0x5f   :  { %323 = vmatpush.msrb.mxu1 %v314_v34  ;;  %v396_v34 = vld [vmem:[%s3353_s7 + $0x10] sm:$0xff]  ;;  %s1550_s17 = sshll.u32 %s2208_s16, 4  ;;  %s1551_s17 = int_to_ptr.vmem [resolvable:$true] %s1550_s17 }
  0x60   :  { %423 = vmatpush.msra.mxu3 %v396_v34  ;;  %v2730_v34 = vshrl.u32 %v1097_v25, 7 }
  0x61   :  { %324 = vmatpush.msrb.mxu1 %v313_v35  ;;  %v2593_v35 = vld [vmem:[#allocation8 + $0x1] ss:$0 sm:$0xff] }
  0x62   :  { %v212_v62 = vmul.f32 %v2593_v35, %v2447_v33  ;;  %v213_v11 = vmul.f32 %v2593_v35, %v2466_v42 }
  0x63   :  { %325 = vmatpush.msrb.mxu1 %v312_v39  ;;  %v395_v39 = vld [vmem:[%s3353_s7 + $0x8] sm:$0xff] }
  0x64   :  { %424 = vmatpush.msra.mxu3 %v395_v39  ;;  %v216_v4 = vadd.f32 %v212_v62, %v2437_v28  ;;  %v217_v20 = vadd.f32 %v213_v11, %v2456_v37  ;;  %v362_v39 = vld [vmem:[%s3352_s6 + $0x70] sm:$0xff]  ;;  %v356_v11 = vld [vmem:[%s3352_s6 + $0x40] sm:$0xff] }
  0x65   :  { %326 = vmatpush.msrb.mxu1 %v311_v40  ;;  %v210_v40 = vmul.f32 %v2593_v35, %v2409_v14 }
  0x66   :  { %296 = vmatmul.f32.gmra.mxu1 %v206_v41  ;;  %v2607_v41 = vld [vmem:[%s3357_s11 + $0x78] sm:$0xff] }
  0x67   :  { %327 = vmatpush.msrb.mxu1 %v310_v43  ;;  %v394_v43 = vld [vmem:[%s3353_s7] sm:$0xff] }
  0x68   :  { %425 = vmatpush.msra.mxu3 %v394_v43  ;;  %v742_v43 = vld [vmem:[#allocation13] sm:$0xff] }
  0x69   :  { %328 = vmatpush.msrb.mxu1 %v309_v44  ;;  %v214_v44 = vadd.f32 %v210_v40, %v2400_v10 }
  0x6b   :  { %329 = vmatpush.msrb.mxu1 %v308_v46  ;;  %v2618_v46 = vld [vmem:[%s3357_s11 + $0x70] sm:$0xff]  ;;  %426 = vmatmul.f32.vlgmr.msra.gmra.mxu3 %v214_v44  ;;  %v1113_v44 = vadd.s32 120, %v2730_v34 }
  0x6d   :  { %330 = vmatpush.msrb.mxu1 %v307_v47  ;;  %v757_v47 = vld [vmem:[#allocation13 + $0x78] sm:$0xff] }
  0x6e   :  { %299 = vmatmul.f32.gmra.mxu1 %v207_v48  ;;  %v2624_v48 = vld [vmem:[%s3357_s11 + $0x68] sm:$0xff]  ;;  %758 = vmatpush.msrb.mxu3 %v757_v47  ;;  %v231_v47 = vmul.f32 %v2695_v15, %v2428_v24 }
  0x6f   :  { %331 = vmatpush.msrb.mxu1 %v306_v50  ;;  %v211_v50 = vmul.f32 %v2593_v35, %v2428_v24 }
  0x70   :  { %759 = vmatpush.msrb.mxu3 %v756_v49 }
  0x71   :  { %332 = vmatpush.msrb.mxu1 %v305_v51  ;;  %v245_v51 = vadd.f32 %v241_v45, %v2418_v19 }
  0x73   :  { %333 = vmatpush.msrb.mxu1 %v304_v53  ;;  %v755_v53 = vld [vmem:[#allocation13 + $0x68] sm:$0xff] }
  0x74   :  { %760 = vmatpush.msrb.mxu3 %v755_v53  ;;  %v2765_v53 = vadd.f32 %v231_v47, %v2418_v19  ;;  %v1102_v47 = vadd.s32 32, %v2730_v34 }
  0x75   :  { %334 = vmatpush.msrb.mxu1 %v303_v54  ;;  %v2639_v54 = vld [vmem:[%s3357_s11 + $0x58] sm:$0xff] }
  0x76   :  { %335 = vmatmul.f32.vlgmr.msrb.gmra.mxu1 %v224_v55  ;;  %v754_v55 = vld [vmem:[#allocation13 + $0x60] sm:$0xff] }
  0x77   :  { %583 = vmatpush.msra.mxu1 %v582_v56  ;;  %v215_v56 = vadd.f32 %v211_v50, %v2418_v19  ;;  %761 = vmatpush.msrb.mxu3 %v754_v55  ;;  %v1112_v50 = vadd.s32 112, %v2730_v34  ;;  %v2203_v55 = vmov 1.0  }
  0x79   :  { %584 = vmatpush.msra.mxu1 %v581_v57  ;;  %v242_v57 = vmul.f32 %v2568_v23, %v2447_v33  ;;  %429 = vmatmul.f32.gmra.mxu3 %v215_v56  ;;  %v745_v23 = vld [vmem:[#allocation13 + $0x18] sm:$0xff]  ;;  %v360_v56 = vld [vmem:[%s3352_s6 + $0x60] sm:$0xff] }
  0x7a   :  { %762 = vmatpush.msrb.mxu3 %v753_v59  ;;  %v1110_v59 = vadd.s32 96, %v2730_v34 }
  0x7b   :  { %585 = vmatpush.msra.mxu1 %v580_v61  ;;  %v752_v61 = vld [vmem:[#allocation13 + $0x50] sm:$0xff] }
  0x7c   :  { %763 = vmatpush.msrb.mxu3 %v752_v61  ;;  %v359_v61 = vld [vmem:[%s3352_s6 + $0x58] sm:$0xff] }
  0x7d   :  { %586 = vmatpush.msra.mxu1 %v579_v63  ;;  %v246_v63 = vadd.f32 %v242_v57, %v2437_v28 }
  0x7e   :  { %338 = vmatmul.f32.gmra.mxu1 %v225_v0  ;;  %v2663_v0 = vld [vmem:[%s3357_s11 + $0x40] sm:$0xff] }
  0x7f   :  { %587 = vmatpush.msra.mxu1 %v578_v1  ;;  %v751_v1 = vld [vmem:[#allocation13 + $0x48] sm:$0xff] }
  0x80   :  { %764 = vmatpush.msrb.mxu3 %v751_v1 }
  0x81   :  { %588 = vmatpush.msra.mxu1 %v577_v2  ;;  %v2669_v2 = vld [vmem:[%s3357_s11 + $0x38] sm:$0xff]  ;;  %432 = vmatmul.f32.gmra.mxu3 %v216_v4 }
  0x82   :  { %765 = vmatpush.msrb.mxu3 %v750_v3  ;;  %v1109_v3 = vadd.s32 88, %v2730_v34 }
  0x83   :  { %589 = vmatpush.msra.mxu1 %v576_v6  ;;  %v2678_v6 = vld [vmem:[%s3357_s11 + $0x30] sm:$0xff] }
  0x84   :  { %766 = vmatpush.msrb.mxu3 %v749_v7 }
  0x85   :  { %590 = vmatpush.msra.mxu1 %v575_v8  ;;  %v2684_v8 = vld [vmem:[%s3357_s11 + $0x28] sm:$0xff] }
  0x86   :  { %341 = vmatmul.f32.gmra.mxu1 %v226_v9  ;;  %v748_v9 = vld [vmem:[#allocation13 + $0x30] sm:$0xff] }
  0x87   :  { %591 = vmatpush.msra.mxu1 %v574_v12  ;;  %v247_v12 = vadd.f32 %v243_v5, %v2456_v37  ;;  %767 = vmatpush.msrb.mxu3 %v748_v9  ;;  %v1108_v9 = vadd.s32 80, %v2730_v34 }
  0x89   :  { %592 = vmatpush.msra.mxu1 %v573_v13  ;;  %v2693_v13 = vld [vmem:[%s3357_s11 + $0x20] sm:$0xff]  ;;  %768 = vmatpush.msrb.mxu3 %v747_v16  ;;  %v1106_v16 = vadd.s32 64, %v2730_v34 }
  0x8a   :  { %435 = vmatmul.f32.gmra.mxu3 %v217_v20 }
  0x8b   :  { %593 = vmatpush.msra.mxu1 %v572_v18  ;;  %v746_v18 = vld [vmem:[#allocation13 + $0x20] sm:$0xff] }
  0x8c   :  { %769 = vmatpush.msrb.mxu3 %v746_v18  ;;  %v355_v18 = vld [vmem:[%s3352_s6 + $0x38] sm:$0xff] }
  0x8d   :  { %594 = vmatpush.msra.mxu1 %v571_v21  ;;  %v2708_v21 = vld [vmem:[%s3357_s11 + $0x10] sm:$0xff] }
  0x8e   :  { %344 = vmatmul.f32.gmra.mxu1 %v227_v22  ;;  %v230_v22 = vmul.f32 %v2695_v15, %v2409_v14  ;;  %770 = vmatpush.msrb.mxu3 %v745_v23 }
  0x8f   :  { %595 = vmatpush.msra.mxu1 %v570_v26  ;;  %v2716_v26 = vld [vmem:[%s3357_s11 + $0x8] sm:$0xff] }
  0x90   :  { %v2725_v30 = vadd.f32 %v230_v22, %v2400_v10  ;;  %771 = vmatpush.msrb.mxu3 %v744_v31  ;;  %v354_v22 = vld [vmem:[%s3352_s6 + $0x30] sm:$0xff] }
  0x91   :  { %596 = vmatpush.msra.mxu1 %v569_v27  ;;  %v1115_v27 = vand.u32 127, %v1097_v25  ;;  %v1105_v25 = vadd.s32 56, %v2730_v34 }
  0x93   :  { %597 = vmatpush.msra.mxu1 %v568_v32  ;;  %v2727_v32 = vld [vmem:[#allocation8 + $0x5] ss:$0 sm:$0xff]  ;;  %v2732_v35 = vmul.u32 64, %v1115_v27 }
  0x94   :  { %v250_v40 = vmul.f32 %v2727_v32, %v2409_v14  ;;  %v361_v14 = vld [vmem:[%s3352_s6 + $0x68] sm:$0xff]  ;;  %v251_v1 = vmul.f32 %v2727_v32, %v2428_v24  ;;  %v252_v23 = vmul.f32 %v2727_v32, %v2447_v33 }
  0x95   :  { %598 = vmatpush.msra.mxu1 %v567_v36  ;;  %v363_v36 = vld [vmem:[%s3352_s6 + $0x78] sm:$0xff]  ;;  %v2745_v45 = vadd.s32 64, %v2732_v35  ;;  %vm1132_vm0 = vcmp.ge.s32.totalorder %v1113_v44, %v2732_v35  ;;  %vm1131_vm3 = vcmp.ge.s32.totalorder %v1112_v50, %v2732_v35  ;;  %vm1129_vm9 = vcmp.ge.s32.totalorder %v1110_v59, %v2732_v35  ;;  %v357_v24 = vld [vmem:[%s3352_s6 + $0x48] sm:$0xff] }
  0x96   :  { %599 = vmatmul.f32.vlgmr.msra.gmra.mxu1 %v244_v38  ;;  %v743_v38 = vld [vmem:[#allocation13 + $0x8] sm:$0xff]  ;;  %364 = vmatpush.msra.mxu2 %v363_v36  ;;  %v254_v49 = vadd.f32 %v250_v40, %v2400_v10  ;;  %v1111_v10 = vadd.s32 104, %v2730_v34  ;;  %v255_v5 = vadd.f32 %v251_v1, %v2418_v19  ;;  %vm1128_vm12 = vcmp.ge.s32.totalorder %v1109_v3, %v2732_v35  ;;  %v353_v36 = vld [vmem:[%s3352_s6 + $0x28] sm:$0xff] }
  0x97   :  { %925 = vmatpush.msrb.mxu1 %v2607_v41  ;;  %772 = vmatpush.msrb.mxu3 %v743_v38  ;;  %vm1149_vm1 = vcmp.lt.s32.totalorder %v1113_v44, %v2745_v45  ;;  %vm1148_vm4 = vcmp.lt.s32.totalorder %v1112_v50, %v2745_v45  ;;  %vm1146_vm10 = vcmp.lt.s32.totalorder %v1110_v59, %v2745_v45  ;;  %v1107_v19 = vadd.s32 72, %v2730_v34  ;;  %v350_v50 = vld [vmem:[%s3352_s6 + $0x10] sm:$0xff] }
  0x98   :  { %365 = vmatpush.msra.mxu2 %v362_v39  ;;  %vm2757_vm2 = vmand %vm1132_vm0, %vm1149_vm1  ;;  %vm1130_vm6 = vcmp.ge.s32.totalorder %v1111_v10, %v2732_v35  ;;  %vm1147_vm7 = vcmp.lt.s32.totalorder %v1111_v10, %v2745_v45  ;;  %vm1145_vm13 = vcmp.lt.s32.totalorder %v1109_v3, %v2745_v45  ;;  %vm1127_vm15 = vcmp.ge.s32.totalorder %v1108_v9, %v2732_v35 }
  0x99   :  { %926 = vmatpush.msrb.mxu1 %v2618_v46  ;;  %773 = vmatpush.msrb.mxu3 %v742_v43  ;;  %vm2773_vm5 = vmand %vm1131_vm3, %vm1148_vm4  ;;  %vm1144_vm0 = vcmp.lt.s32.totalorder %v1108_v9, %v2745_v45  ;;  %vm1126_vm3 = vcmp.ge.s32.totalorder %v1107_v19, %v2732_v35  ;;  %vm1143_vm4 = vcmp.lt.s32.totalorder %v1107_v19, %v2745_v45  ;;  %v1104_v39 = vadd.s32 48, %v2730_v34  ;;  %v352_v43 = vld [vmem:[%s3352_s6 + $0x20] sm:$0xff] }
  0x9a   :  { %774 = vmatmul.f32.vlgmr.msrb.gmra.mxu3 %v254_v49  ;;  %366 = vmatpush.msra.mxu2 %v361_v14  ;;  %vm2786_vm8 = vmand %vm1130_vm6, %vm1147_vm7  ;;  %vm1125_vm7 = vcmp.ge.s32.totalorder %v1106_v16, %v2732_v35  ;;  %v256_v31 = vadd.f32 %v252_v23, %v2437_v28  ;;  %v1103_v40 = vadd.s32 40, %v2730_v34  ;;  %v3405_v44 = vmov 0  ;;  %v351_v49 = vld [vmem:[%s3352_s6 + $0x18] sm:$0xff] }
  0x9b   :  { %927 = vmatpush.msrb.mxu1 %v2624_v48  ;;  %1625 = vmatpush.msk.msra.mxu3 %vm2757_vm2, %v2203_v55  ;;  %vm2802_vm11 = vmand %vm1129_vm9, %vm1146_vm10  ;;  %vm1142_vm9 = vcmp.lt.s32.totalorder %v1106_v16, %v2745_v45  ;;  %v3407_v14 = vmov 0  ;;  %v253_v10 = vmul.f32 %v2727_v32, %v2466_v42  ;;  %v3409_v59 = vmov 0  ;;  %v349_v32 = vld [vmem:[%s3352_s6 + $0x8] sm:$0xff] }
  0x9c   :  { %367 = vmatpush.msra.mxu2 %v360_v56  ;;  %vm2812_vm14 = vmand %vm1128_vm12, %vm1145_vm13  ;;  %vm1124_vm12 = vcmp.ge.s32.totalorder %v1105_v25, %v2732_v35  ;;  %vm1141_vm13 = vcmp.lt.s32.totalorder %v1105_v25, %v2745_v45  ;;  %v1101_v56 = vadd.s32 24, %v2730_v34  ;;  %v1100_v1 = vadd.s32 16, %v2730_v34  ;;  %v614_v25 = vld [vmem:[#allocation10 + $0x10] sm:$0xff] }
  0x9d   :  { %928 = vmatpush.msrb.mxu1 %v2633_v52  ;;  %1626 = vmatpush.msk.msra.mxu3 %vm2773_vm5, %v2203_v55  ;;  %vm2829_vm1 = vmand %vm1127_vm15, %vm1144_vm0  ;;  %vm1123_vm0 = vcmp.ge.s32.totalorder %v1104_v39, %v2732_v35  ;;  %v1099_v3 = vadd.s32 8, %v2730_v34 }
  0x9e   :  { %602 = vmatmul.f32.gmra.mxu1 %v245_v51  ;;  %368 = vmatpush.msra.mxu2 %v359_v61  ;;  %vm2842_vm6 = vmand %vm1126_vm3, %vm1143_vm4  ;;  %vm1140_vm3 = vcmp.lt.s32.totalorder %v1104_v39, %v2745_v45  ;;  %v257_v61 = vadd.f32 %v253_v10, %v2456_v37  ;;  %v1706_v39 = vld [vmem:[#allocation8 + $0x6] ss:$0 sm:$0xff]  ;;  %v444_v10 = vld [vmem:[%s3354_s8 + $0x8] sm:$0xff] }
  0x9f   :  { %929 = vmatpush.msrb.mxu1 %v2639_v54  ;;  %1627 = vmatpush.msk.msra.mxu3 %vm2786_vm8, %v2203_v55  ;;  %vm2857_vm10 = vmand %vm1125_vm7, %vm1142_vm9  ;;  %vm1122_vm7 = vcmp.ge.s32.totalorder %v1103_v40, %v2732_v35  ;;  %vm1139_vm9 = vcmp.lt.s32.totalorder %v1103_v40, %v2745_v45 }
  0xa0   :  { %vm2867_vm15 = vmand %vm1124_vm12, %vm1141_vm13  ;;  %vm1121_vm13 = vcmp.ge.s32.totalorder %v1102_v47, %v2732_v35 }
  0xa1   :  { %930 = vmatpush.msrb.mxu1 %v2648_v58  ;;  %1628 = vmatpush.msk.msra.mxu3 %vm2802_vm11, %v2203_v55  ;;  %vm2884_vm4 = vmand %vm1123_vm0, %vm1140_vm3  ;;  %vm1138_vm0 = vcmp.lt.s32.totalorder %v1102_v47, %v2745_v45  ;;  %v956_v47 = vld [vmem:[#allocation11 + $0x10] sm:$0xff] }
  0xa2   :  { %777 = vmatmul.f32.gmra.mxu3 %v255_v5  ;;  %v3406_v44 = vsel %vm2884_vm4, 4294967295, %v3405_v44  ;;  %vm2897_vm12 = vmand %vm1122_vm7, %vm1139_vm9  ;;  %vm1120_vm7 = vcmp.ge.s32.totalorder %v1101_v56, %v2732_v35  ;;  %vm1137_vm9 = vcmp.lt.s32.totalorder %v1101_v56, %v2745_v45  ;;  %v348_v5 = vld [vmem:[%s3352_s6] sm:$0xff]  ;;  %v954_v56 = vld [vmem:[#allocation11] sm:$0xff] }
  0xa3   :  { %931 = vmatpush.msrb.mxu1 %v2654_v60  ;;  %1629 = vmatpush.msk.msra.mxu3 %vm2812_vm14, %v2203_v55  ;;  %v3408_v14 = vsel %vm2897_vm12, 4294967295, %v3407_v14  ;;  %vm2912_vm3 = vmand %vm1121_vm13, %vm1138_vm0  ;;  %vm1119_vm13 = vcmp.ge.s32.totalorder %v1100_v1, %v2732_v35  ;;  %vm1136_vm0 = vcmp.lt.s32.totalorder %v1100_v1, %v2745_v45 }
  0xa4   :  { %v3410_v59 = vsel %vm2912_vm3, 4294967295, %v3409_v59 }
  0xa5   :  { %932 = vmatpush.msrb.mxu1 %v2663_v0  ;;  %1630 = vmatpush.msk.msra.mxu3 %vm2829_vm1, %v2203_v55 }
  0xa6   :  { %605 = vmatmul.f32.gmra.mxu1 %v246_v63  ;;  %v358_v63 = vld [vmem:[%s3352_s6 + $0x50] sm:$0xff] }
  0xa7   :  { %933 = vmatpush.msrb.mxu1 %v2669_v2  ;;  %369 = vmatpush.msra.mxu2 %v358_v63  ;;  %v3411_v63 = vmov 0 }
  0xa8   :  { %1631 = vmatpush.msk.msra.mxu3 %vm2842_vm6, %v2203_v55 }
  0xa9   :  { %934 = vmatpush.msrb.mxu1 %v2678_v6  ;;  %370 = vmatpush.msra.mxu2 %v357_v24 }
  0xaa   :  { %1632 = vmatpush.msk.msra.mxu3 %vm2857_vm10, %v2203_v55 }
  0xab   :  { %935 = vmatpush.msrb.mxu1 %v2684_v8  ;;  %371 = vmatpush.msra.mxu2 %v356_v11  ;;  %v619_v11 = vld [vmem:[#allocation10 + $0x38] sm:$0xff] }
  0xac   :  { %780 = vmatmul.f32.gmra.mxu3 %v256_v31 }
  0xad   :  { %936 = vmatpush.msrb.mxu1 %v2693_v13  ;;  %372 = vmatpush.msra.mxu2 %v355_v18  ;;  %v232_v18 = vmul.f32 %v2695_v15, %v2447_v33  ;;  %v612_v33 = vld [vmem:[#allocation10] sm:$0xff] }
  0xae   :  { %608 = vmatmul.f32.gmra.mxu1 %v247_v12  ;;  %1633 = vmatpush.msk.msra.mxu3 %vm2867_vm15, %v2203_v55 }
  0xaf   :  { %937 = vmatpush.msrb.mxu1 %v2701_v17  ;;  %373 = vmatpush.msra.mxu2 %v354_v22  ;;  %v2971_v22 = vadd.f32 %v232_v18, %v2437_v28  ;;  %v613_v28 = vld [vmem:[#allocation10 + $0x8] sm:$0xff]  ;;  %v874_v18 = vld [vmem:[#allocation14 + $0x58] sm:$0xff] }
  0xb0   :  { %1634 = vmatpush.msk.msra.mxu3 %vm2884_vm4, %v2203_v55  ;;  %vm2922_vm4 = vmand %vm1120_vm7, %vm1137_vm9  ;;  %vm1118_vm9 = vcmp.ge.s32.totalorder %v1099_v3, %v2732_v35 }
  0xb1   :  { %938 = vmatpush.msrb.mxu1 %v2708_v21  ;;  %374 = vmatpush.msra.mxu2 %v353_v36  ;;  %v3412_v63 = vsel %vm2922_vm4, 4294967295, %v3411_v63  ;;  %vm2939_vm7 = vmand %vm1119_vm13, %vm1136_vm0  ;;  %vm1117_vm13 = vcmp.ge.s32.totalorder %v2730_v34, %v2732_v35  ;;  %vm1134_vm0 = vcmp.lt.s32.totalorder %v2730_v34, %v2745_v45  ;;  %v617_v34 = vld [vmem:[#allocation10 + $0x28] sm:$0xff] }
  0xb2   :  { %1635 = vmatpush.msk.msra.mxu3 %vm2897_vm12, %v2203_v55  ;;  %vm2960_vm12 = vmand %vm1117_vm13, %vm1134_vm0  ;;  %vm1333_vm13 = vcmask 15360   ;;  %vm3420_vm0 = vnez %v3408_v14 }
  0xb3   :  { %939 = vmatpush.msrb.mxu1 %v2716_v26  ;;  %375 = vmatpush.msra.mxu2 %v352_v43  ;;  %v446_v43 = vld [vmem:[%s3354_s8 + $0x18] sm:$0xff] }
  0xb4   :  { %1636 = vmatpush.msk.msra.mxu3 %vm2912_vm3, %v2203_v55  ;;  %vm1135_vm3 = vcmp.lt.s32.totalorder %v1099_v3, %v2745_v45  ;;  %v616_v45 = vld [vmem:[#allocation10 + $0x20] sm:$0xff]  ;;  %v443_v3 = vld [vmem:[%s3354_s8] sm:$0xff] }
  0xb5   :  { %940 = vmatpush.msrb.mxu1 %v2722_v29  ;;  %376 = vmatpush.msra.mxu2 %v351_v49  ;;  %v445_v49 = vld [vmem:[%s3354_s8 + $0x10] sm:$0xff] }
  0xb6   :  { %941 = vmatmul.f32.vlgmr.msrb.gmra.mxu1 %v2725_v30  ;;  %783 = vmatmul.f32.gmra.mxu3 %v257_v61 }
  0xb7   :  { %377 = vmatpush.msra.mxu2 %v350_v50  ;;  %1637 = vmatpush.msk.msra.mxu3 %vm2922_vm4, %v2203_v55  ;;  %vm2949_vm4 = vmand %vm1118_vm9, %vm1135_vm3  ;;  %vm451_vm3 = vcmask 523264   ;;  %v955_v50 = vld [vmem:[#allocation11 + $0x8] sm:$0xff]  ;;  %vm958_vm9 = vcmask 261120  }
  0xb9   :  { %378 = vmatpush.msra.mxu2 %v349_v32  ;;  %1638 = vmatpush.msk.msra.mxu3 %vm2939_vm7, %v2203_v55 }
  0xbb   :  { %379 = vmatpush.msra.mxu2 %v348_v5  ;;  %1639 = vmatpush.msk.msra.mxu3 %vm2949_vm4, %v2203_v55  ;;  %v878_v5 = vld [vmem:[#allocation14 + $0x78] sm:$0xff] }
  0xbc   :  { %380 = vmatmul.f32.vlgmr.msra.gmra.mxu2 %v2725_v30  ;;  %v618_v30 = vld [vmem:[#allocation10 + $0x30] sm:$0xff] }
  0xbd   :  { %640 = vmatpush.msrb.mxu2 %v619_v11  ;;  %1640 = vmatpush.msk.msra.mxu3 %vm2960_vm12, %v2203_v55  ;;  %v615_v55 = vld [vmem:[#allocation10 + $0x18] sm:$0xff]  ;;  %v876_v11 = vld [vmem:[#allocation14 + $0x68] sm:$0xff] }
  0xbe   :  { %944 = vmatmul.f32.gmra.mxu1 %v2765_v53 }
  0xbf   :  { %641 = vmatpush.msrb.mxu2 %v618_v30  ;;  %v875_v30 = vld [vmem:[#allocation14 + $0x60] sm:$0xff] }
  0xc1   :  { %642 = vmatpush.msrb.mxu2 %v617_v34 }
  0xc3   :  { %643 = vmatpush.msrb.mxu2 %v616_v45 }
  0xc4   :  { %383 = vmatmul.f32.gmra.mxu2 %v2765_v53  ;;  %v233_v53 = vmul.f32 %v2695_v15, %v2466_v42  ;;  %v448_v15 = vld [vmem:[%s3354_s8 + $0x28] sm:$0xff] }
  0xc5   :  { %644 = vmatpush.msrb.mxu2 %v615_v55  ;;  %v872_v55 = vld [vmem:[#allocation14 + $0x48] sm:$0xff] }
  0xc6   :  { %v2977_v31 = vadd.f32 %v233_v53, %v2456_v37 }
  0xc7   :  { %645 = vmatpush.msrb.mxu2 %v614_v25  ;;  %v871_v25 = vld [vmem:[#allocation14 + $0x40] sm:$0xff] }
  0xc9   :  { %646 = vmatpush.msrb.mxu2 %v613_v28 }
  0xcb   :  { %647 = vmatpush.msrb.mxu2 %v612_v33  ;;  %v869_v33 = vld [vmem:[#allocation14 + $0x30] sm:$0xff] }
  0xcc   :  { %386 = vmatmul.f32.gmra.mxu2 %v2971_v22 }
  0xcd   :  { %1665 = vmatpush.msra.mxu2 %v2607_v41 }
  0xcf   :  { %1666 = vmatpush.msra.mxu2 %v2618_v46 }
  0xd1   :  { %1667 = vmatpush.msra.mxu2 %v2624_v48 }
  0xd3   :  { %v291_v9 = vpop.f32.mrf.mxu1  ;;  %1668 = vmatpush.msra.mxu2 %v2633_v52 }
  0xd4   :  { %1427 = vst [vmem:[#allocation16] sm:$0xff] %v291_v9  ;;  %389 = vmatmul.f32.gmra.mxu2 %v2977_v31  ;;  %v877_v9 = vld [vmem:[#allocation14 + $0x70] sm:$0xff] }
  0xd5   :  { %1669 = vmatpush.msra.mxu2 %v2639_v54 }
  0xd7   :  { %1670 = vmatpush.msra.mxu2 %v2648_v58 }
  0xd9   :  { %1671 = vmatpush.msra.mxu2 %v2654_v60 }
  0xdb   :  { %v294_v35 = vpop.f32.mrf.mxu1  ;;  %1672 = vmatpush.msra.mxu2 %v2663_v0 }
  0xdc   :  { %1428 = vst [vmem:[#allocation16 + $0x8] sm:$0xff] %v294_v35 }
  0xdd   :  { %1673 = vmatpush.msra.mxu2 %v2669_v2 }
  0xdf   :  { %1674 = vmatpush.msra.mxu2 %v2678_v6 }
  0xe1   :  { %1675 = vmatpush.msra.mxu2 %v2684_v8  ;;  %v450_v8 = vld [vmem:[%s3354_s8 + $0x38] sm:$0xff] }
  0xe2   :  { %472 = vmatpush.msra.mxu0 %v450_v8  ;;  %v865_v8 = vld [vmem:[#allocation14 + $0x10] sm:$0xff] }
  0xe3   :  { %v297_v23 = vpop.f32.mrf.mxu1  ;;  %1676 = vmatpush.msra.mxu2 %v2693_v13  ;;  %v449_v13 = vld [vmem:[%s3354_s8 + $0x30] sm:$0xff] }
  0xe4   :  { %1429 = vst [vmem:[#allocation16 + $0x10] sm:$0xff] %v297_v23  ;;  %473 = vmatpush.msra.mxu0 %v449_v13  ;;  %v873_v23 = vld [vmem:[#allocation14 + $0x50] sm:$0xff]  ;;  %v864_v13 = vld [vmem:[#allocation14 + $0x8] sm:$0xff] }
  0xe5   :  { %1677 = vmatpush.msra.mxu2 %v2701_v17 }
  0xe6   :  { %474 = vmatpush.msra.mxu0 %v448_v15 }
  0xe7   :  { %1678 = vmatpush.msra.mxu2 %v2708_v21 }
  0xe9   :  { %1679 = vmatpush.msra.mxu2 %v2716_v26  ;;  %v447_v26 = vld [vmem:[%s3354_s8 + $0x20] sm:$0xff] }
  0xea   :  { %475 = vmatpush.msra.mxu0 %v447_v26 }
  0xeb   :  { %v300_v36 = vpop.f32.mrf.mxu1  ;;  %1680 = vmatpush.msra.mxu2 %v2722_v29  ;;  %v957_v29 = vld [vmem:[#allocation11 + $0x18] sm:$0xff] }
  0xec   :  { %1430 = vst [vmem:[#allocation16 + $0x18] sm:$0xff] %v300_v36  ;;  %476 = vmatpush.msra.mxu0 %v446_v43  ;;  %v870_v36 = vld [vmem:[#allocation14 + $0x38] sm:$0xff] }
  0xed   :  { %1493 = dma.vmem_to_hbm [thread:$0]  %s1486_s29, 512, %s1488_s1, [#allocation4], %s2194_s5, %s2194_s5, %s2195_s22  }
  0xee   :  { %v427_v21 = vpop.f32.mrf.mxu3  ;;  %477 = vmatpush.msra.mxu0 %v445_v49  ;;  %s2211_s1 = smov [#allocation22]  }
  0xef   :  { %1711 = vtanh.f32 %v427_v21  ;;  %v2204_v21 = vmov 0.0   ;;  %s1537_s3 = sshll.u32 %s2211_s1, 4  ;;  %s1538_s3 = int_to_ptr.vmem [resolvable:$true] %s1537_s3 }
  0xf0   :  { %478 = vmatpush.msra.mxu0 %v444_v10  ;;  %v1181_v26 = vsel %vm2757_vm2, 1.0, %v2204_v21  ;;  %v1180_v43 = vsel %vm2773_vm5, 1.0, %v2204_v21  ;;  %v1179_v51 = vsel %vm2786_vm8, 1.0, %v2204_v21  ;;  %v1178_v57 = vsel %vm2802_vm11, 1.0, %v2204_v21 }
  0xf1   :  { %v1177_v62 = vsel %vm2812_vm14, 1.0, %v2204_v21  ;;  %v1176_v4 = vsel %vm2829_vm1, 1.0, %v2204_v21  ;;  %v1175_v7 = vsel %vm2842_vm6, 1.0, %v2204_v21  ;;  %vm3419_vm14 = vnez %v3406_v44 }
  0xf2   :  { %479 = vmatpush.msra.mxu0 %v443_v3  ;;  %v1167_v24 = vsel %vm2949_vm4, 1.0, %v2204_v21 }
  0xf3   :  { %v2982_v40 = vpop.f32.mrf.mxu1 }
  0xf4   :  { %v2985_v42 = vmul.f32 %v1706_v39, %v2982_v40  ;;  %879 = vmatpush.msrb.mxu0 %v878_v5 }
  0xf5   :  { %v1712_v1 = vpop.eup %1711 }
  0xf6   :  { %v1188_v37 = vmul.f32 %v2985_v42, %v2985_v42  ;;  %1609 = vmatmul.msk.f32.vlgmr.msra.gmra.mxu0 %vm451_vm3, %v1712_v1 }
  0xf7   :  { %880 = vmatpush.msrb.mxu0 %v877_v9 }
  0xf8   :  { %1208 = vmatmul.f32.vlgmr.msra.gmra.mxu3 %v1188_v37  ;;  %v867_v37 = vld [vmem:[#allocation14 + $0x20] sm:$0xff] }
  0xf9   :  { %881 = vmatpush.msrb.mxu0 %v876_v11 }
  0xfb   :  { %v2993_v41 = vpop.f32.mrf.mxu1  ;;  %882 = vmatpush.msrb.mxu0 %v875_v30 }
  0xfc   :  { %v2996_v46 = vmul.f32 %v1706_v39, %v2993_v41  ;;  %v430_v32 = vpop.f32.mrf.mxu3 }
  0xfd   :  { %1713 = vtanh.f32 %v430_v32  ;;  %883 = vmatpush.msrb.mxu0 %v874_v18 }
  0xfe   :  { %v1189_v48 = vmul.f32 %v2996_v46, %v2996_v46 }
  0xff   :  { %884 = vmatpush.msrb.mxu0 %v873_v23 }
 0x100   :  { %1211 = vmatmul.f32.gmra.mxu3 %v1189_v48  ;;  %v866_v48 = vld [vmem:[#allocation14 + $0x18] sm:$0xff] }
 0x101   :  { %885 = vmatpush.msrb.mxu0 %v872_v55 }
 0x103   :  { %v3004_v52 = vpop.f32.mrf.mxu1  ;;  %v1714_v45 = vpop.eup %1713  ;;  %886 = vmatpush.msrb.mxu0 %v871_v25  ;;  %v1174_v25 = vsel %vm2857_vm10, 1.0, %v2204_v21 }
 0x104   :  { %v3007_v54 = vmul.f32 %v1706_v39, %v3004_v52  ;;  %v433_v34 = vpop.f32.mrf.mxu3  ;;  %1610 = vmatmul.msk.f32.gmra.mxu0 %vm451_vm3, %v1714_v45 }
 0x105   :  { %1715 = vtanh.f32 %v433_v34  ;;  %887 = vmatpush.msrb.mxu0 %v870_v36 }
 0x106   :  { %v1190_v58 = vmul.f32 %v3007_v54, %v3007_v54 }
 0x107   :  { %888 = vmatpush.msrb.mxu0 %v869_v33 }
 0x108   :  { %1214 = vmatmul.f32.gmra.mxu3 %v1190_v58 }
 0x10b   :  { %v3015_v60 = vpop.f32.mrf.mxu1  ;;  %v1716_v28 = vpop.eup %1715 }
 0x10c   :  { %v3018_v0 = vmul.f32 %v1706_v39, %v3015_v60  ;;  %v868_v39 = vld [vmem:[#allocation14 + $0x28] sm:$0xff]  ;;  %1611 = vmatmul.msk.f32.gmra.mxu0 %vm451_vm3, %v1716_v28 }
 0x10d   :  { %v436_v53 = vpop.f32.mrf.mxu3  ;;  %889 = vmatpush.msrb.mxu0 %v868_v39 }
 0x10e   :  { %v1191_v2 = vmul.f32 %v3018_v0, %v3018_v0  ;;  %1717 = vtanh.f32 %v436_v53 }
 0x10f   :  { %890 = vmatpush.msrb.mxu0 %v867_v37 }
 0x110   :  { %1217 = vmatmul.f32.gmra.mxu3 %v1191_v2 }
 0x111   :  { %891 = vmatpush.msrb.mxu0 %v866_v48  ;;  %v1173_v48 = vsel %vm2867_vm15, 1.0, %v2204_v21 }
 0x113   :  { %v600_v6 = vpop.f32.mrf.mxu1  ;;  %892 = vmatpush.msrb.mxu0 %v865_v8 }
 0x114   :  { %1617 = vmatmul.msk.f32.vlgmr.msrb.gmra.mxu2 %vm451_vm3, %v600_v6  ;;  %v1718_v58 = vpop.eup %1717 }
 0x115   :  { %983 = vmatpush.msrb.mxu2 %v957_v29  ;;  %1612 = vmatmul.msk.f32.gmra.mxu0 %vm451_vm3, %v1718_v58 }
 0x116   :  { %893 = vmatpush.msrb.mxu0 %v864_v13 }
 0x117   :  { %984 = vmatpush.msrb.mxu2 %v956_v47 }
 0x119   :  { %985 = vmatpush.msrb.mxu2 %v955_v50 }
 0x11b   :  { %v603_v17 = vpop.f32.mrf.mxu1  ;;  %986 = vmatpush.msrb.mxu2 %v954_v56 }
 0x11c   :  { %1618 = vmatmul.msk.f32.gmra.mxu2 %vm451_vm3, %v603_v17  ;;  %v863_v17 = vld [vmem:[#allocation14] sm:$0xff] }
 0x11d   :  { %v775_v2 = vpop.f32.mrf.mxu3  ;;  %894 = vmatpush.msrb.mxu0 %v863_v17 }
 0x11e   :  { %v787_v6 = vsub.f32 0.0, %v775_v2 }
 0x11f   :  { %1641 = vmatpush.xpose.msk.msra.mxu0 %vm1333_vm13, %v1181_v26 }
 0x120   :  { %v791_v15 = vmul.f32 1.442695, %v787_v6 }
 0x122   :  { %1719 = vpow2.f32 %v791_v15 }
 0x123   :  { %v606_v61 = vpop.f32.mrf.mxu1  ;;  %1642 = vmatpush.xpose.msk.msra.mxu0 %vm1333_vm13, %v1180_v43 }
 0x124   :  { %1619 = vmatmul.msk.f32.gmra.mxu2 %vm451_vm3, %v606_v61 }
 0x127   :  { %1643 = vmatpush.xpose.msk.msra.mxu0 %vm1333_vm13, %v1179_v51 }
 0x128   :  { %v1720_v50 = vpop.eup %1719 }
 0x129   :  { %v799_v56 = vadd.f32 1.0, %v1720_v50 }
 0x12b   :  { %v609_v35 = vpop.f32.mrf.mxu1  ;;  %1644 = vmatpush.xpose.msk.msra.mxu0 %vm1333_vm13, %v1178_v57  ;;  %v814_v12 = vand.u32 2147483648, %v799_v56  ;;  %vm808_vm2 = vweird.f32 %v799_v56  ;;  %v812_v36 = vand.u32 2147483647, %v799_v56 }
 0x12c   :  { %1620 = vmatmul.msk.f32.gmra.mxu2 %vm451_vm3, %v609_v35  ;;  %vm3421_vm3 = vnez %v3410_v59 }
 0x12d   :  { %v815_v28 = vor.u32 1.1754944e-38, %v814_v12  ;;  %vm813_vm11 = vcmp.eq.f32.partialorder %v812_v36, 8.507059e+37  ;;  %v1170_v51 = vsel %vm3421_vm3, 1.0, %v2204_v21 }
 0x12f   :  { %1645 = vmatpush.xpose.msk.msra.mxu0 %vm1333_vm13, %v1177_v62 }
 0x133   :  { %1646 = vmatpush.xpose.msk.msra.mxu0 %vm1333_vm13, %v1176_v4 }
 0x134   :  { %947 = vmatmul.f32.vlgmr.msra.gmra.mxu2 %v2971_v22  ;;  %v942_v22 = vpop.f32.mrf.mxu1 }
 0x137   :  { %1647 = vmatpush.xpose.msk.msra.mxu0 %vm1333_vm13, %v1175_v7 }
 0x13b   :  { %1648 = vmatpush.xpose.msk.msra.mxu0 %vm1333_vm13, %v1174_v25 }
 0x13c   :  { %950 = vmatmul.f32.gmra.mxu2 %v2977_v31  ;;  %v778_v31 = vpop.f32.mrf.mxu3  ;;  %v945_v49 = vpop.f32.mrf.mxu1 }
 0x13d   :  { %v788_v29 = vsub.f32 0.0, %v778_v31 }
 0x13f   :  { %v793_v47 = vmul.f32 1.442695, %v788_v29  ;;  %1649 = vmatpush.xpose.msk.msra.mxu0 %vm1333_vm13, %v1173_v48  ;;  %v1171_v29 = vsel %vm3420_vm0, 1.0, %v2204_v21 }
 0x141   :  { %1721 = vpow2.f32 %v793_v47 }
 0x142   :  { %1723 = vrcp.f32 %v799_v56 }
 0x144   :  { %1621 = vmatmul.msk.f32.vlgmr.msrb.gmra.mxu2 %vm958_vm9, %v942_v22  ;;  %v781_v10 = vpop.f32.mrf.mxu3  ;;  %v1172_v22 = vsel %vm3419_vm14, 1.0, %v2204_v21  ;;  %vm3422_vm14 = vnez %v3412_v63 }
 0x145   :  { %v789_v61 = vsub.f32 0.0, %v781_v10  ;;  %1650 = vmatpush.xpose.msk.msra.mxu0 %vm1333_vm13, %v1172_v22 }
 0x147   :  { %v795_v32 = vmul.f32 1.442695, %v789_v61  ;;  %v1722_v1 = vpop.eup %1721 }
 0x148   :  { %v800_v5 = vadd.f32 1.0, %v1722_v1  ;;  %v1724_v11 = vpop.eup %1723  ;;  %v1169_v1 = vsel %vm3422_vm14, 1.0, %v2204_v21 }
 0x149   :  { %1725 = vpow2.f32 %v795_v32  ;;  %v804_v34 = vmul.f32 %v1724_v11, %v799_v56  ;;  %vm809_vm5 = vweird.f32 %v1724_v11  ;;  %1651 = vmatpush.xpose.msk.msra.mxu0 %vm1333_vm13, %v1171_v29 }
 0x14a   :  { %1727 = vrcp.f32 %v800_v5  ;;  %vm810_vm8 = vmor %vm808_vm2, %vm809_vm5  ;;  %v829_v8 = vand.u32 2147483648, %v800_v5  ;;  %vm823_vm1 = vweird.f32 %v800_v5  ;;  %v827_v15 = vand.u32 2147483647, %v800_v5 }
 0x14b   :  { %v805_v18 = vsub.f32 1.0, %v804_v34 }
 0x14c   :  { %1622 = vmatmul.msk.f32.gmra.mxu2 %vm958_vm9, %v945_v49  ;;  %v784_v3 = vpop.f32.mrf.mxu3  ;;  %v830_v17 = vor.u32 1.1754944e-38, %v829_v8  ;;  %vm828_vm15 = vcmp.eq.f32.partialorder %v827_v15, 8.507059e+37  ;;  %v3104_v49 = vpop.f32.mrf.mxu2  ;;  %v3135_v15 = vld [vmem:[#allocation8 + $0x9] ss:$0 sm:$0xff] }
 0x14d   :  { %v790_v9 = vsub.f32 0.0, %v784_v3  ;;  %v806_v23 = vmul.f32 %v1724_v11, %v805_v18  ;;  %1652 = vmatpush.xpose.msk.msra.mxu0 %vm1333_vm13, %v1170_v51 }
 0x14f   :  { %v797_v30 = vmul.f32 1.442695, %v790_v9  ;;  %v1726_v35 = vpop.eup %1725  ;;  %v807_v53 = vadd.f32 %v1724_v11, %v806_v23 }
 0x150   :  { %v801_v45 = vadd.f32 1.0, %v1726_v35  ;;  %v1728_v55 = vpop.eup %1727 }
 0x151   :  { %1729 = vpow2.f32 %v797_v30  ;;  %v819_v33 = vmul.f32 %v1728_v55, %v800_v5  ;;  %v811_v39 = vsel %vm810_vm8, %v1724_v11, %v807_v53  ;;  %vm824_vm6 = vweird.f32 %v1728_v55  ;;  %1653 = vmatpush.xpose.msk.msra.mxu0 %vm1333_vm13, %v1169_v1 }
 0x152   :  { %1731 = vrcp.f32 %v801_v45  ;;  %v816_v37 = vsel %vm813_vm11, %v815_v28, %v811_v39  ;;  %vm825_vm10 = vmor %vm823_vm1, %vm824_vm6  ;;  %v844_v50 = vand.u32 2147483648, %v801_v45  ;;  %vm838_vm2 = vweird.f32 %v801_v45 }
 0x153   :  { %v820_v58 = vsub.f32 1.0, %v819_v33  ;;  %895 = vmatmul.f32.vlgmr.msrb.gmra.mxu0 %v816_v37  ;;  %v842_v56 = vand.u32 2147483647, %v801_v45  ;;  %v1168_v5 = vsel %vm2939_vm7, 1.0, %v2204_v21 }
 0x154   :  { %v845_v61 = vor.u32 1.1754944e-38, %v844_v50  ;;  %v3117_v4 = vpop.f32.mrf.mxu2 }
 0x155   :  { %v821_v6 = vmul.f32 %v1728_v55, %v820_v58  ;;  %vm843_vm11 = vcmp.eq.f32.partialorder %v842_v56, 8.507059e+37  ;;  %1654 = vmatpush.xpose.msk.msra.mxu0 %vm1333_vm13, %v1168_v5 }
 0x157   :  { %v1730_v20 = vpop.eup %1729  ;;  %v822_v13 = vadd.f32 %v1728_v55, %v821_v6 }
 0x158   :  { %v802_v27 = vadd.f32 1.0, %v1730_v20  ;;  %v1732_v2 = vpop.eup %1731 }
 0x159   :  { %v834_v38 = vmul.f32 %v1732_v2, %v801_v45  ;;  %v826_v26 = vsel %vm825_vm10, %v1728_v55, %v822_v13  ;;  %vm839_vm5 = vweird.f32 %v1732_v2  ;;  %1655 = vmatpush.xpose.msk.msra.mxu0 %vm1333_vm13, %v1167_v24  ;;  %v1166_v45 = vsel %vm2960_vm12, 1.0, %v2204_v21 }
 0x15a   :  { %1733 = vrcp.f32 %v802_v27  ;;  %v831_v31 = vsel %vm828_vm15, %v830_v17, %v826_v26  ;;  %vm840_vm8 = vmor %vm838_vm2, %vm839_vm5  ;;  %v859_v3 = vand.u32 2147483648, %v802_v27  ;;  %vm853_vm1 = vweird.f32 %v802_v27 }
 0x15b   :  { %v835_v43 = vsub.f32 1.0, %v834_v38  ;;  %898 = vmatmul.f32.gmra.mxu0 %v831_v31  ;;  %v857_v11 = vand.u32 2147483647, %v802_v27 }
 0x15c   :  { %v860_v30 = vor.u32 1.1754944e-38, %v859_v3  ;;  %v3127_v55 = vpop.f32.mrf.mxu2 }
 0x15d   :  { %v836_v44 = vmul.f32 %v1732_v2, %v835_v43  ;;  %vm858_vm15 = vcmp.eq.f32.partialorder %v857_v11, 8.507059e+37  ;;  %1656 = vmatpush.xpose.msk.msra.mxu0 %vm1333_vm13, %v1166_v45 }
 0x15f   :  { %v837_v10 = vadd.f32 %v1732_v2, %v836_v44 }
 0x160   :  { %v1734_v47 = vpop.eup %1733 }
 0x161   :  { %v849_v14 = vmul.f32 %v1734_v47, %v802_v27  ;;  %v841_v57 = vsel %vm840_vm8, %v1732_v2, %v837_v10  ;;  %vm854_vm6 = vweird.f32 %v1734_v47 }
 0x162   :  { %v846_v32 = vsel %vm843_vm11, %v845_v61, %v841_v57  ;;  %vm855_vm10 = vmor %vm853_vm1, %vm854_vm6 }
 0x163   :  { %v850_v62 = vsub.f32 1.0, %v849_v14  ;;  %901 = vmatmul.f32.gmra.mxu0 %v846_v32 }
 0x164   :  { %v3130_v16 = vpop.f32.mrf.mxu2 }
 0x165   :  { %v851_v59 = vmul.f32 %v1734_v47, %v850_v62 }
 0x167   :  { %v852_v9 = vadd.f32 %v1734_v47, %v851_v59 }
 0x169   :  { %v856_v63 = vsel %vm855_vm10, %v1734_v47, %v852_v9 }
 0x16a   :  { %v861_v34 = vsel %vm858_vm15, %v860_v30, %v856_v63 }
 0x16b   :  { %904 = vmatmul.f32.gmra.mxu0 %v861_v34 }
 0x17b   :  { %v1209_v35 = vpop.f32.mrf.mxu3 }
 0x17c   :  { %1735 = vrsqrt.f32 %v1209_v35  ;;  %vm1228_vm4 = vcmp.eq.f32.partialorder %v1209_v35, inf  ;;  %v1231_v21 = vand.u32 2147483648, %v1209_v35  ;;  %vm1230_vm12 = vcmp.eq.f32.partialorder %v1209_v35, 0.0 }
 0x182   :  { %v1736_v7 = vpop.eup %1735 }
 0x183   :  { %v1222_v18 = vmul.f32 %v1736_v7, %v1209_v35  ;;  %v1212_v23 = vpop.f32.mrf.mxu3 }
 0x184   :  { %1737 = vrsqrt.f32 %v1212_v23  ;;  %vm1240_vm7 = vcmp.eq.f32.partialorder %v1212_v23, inf  ;;  %v1243_v26 = vand.u32 2147483648, %v1212_v23  ;;  %vm1242_vm0 = vcmp.eq.f32.partialorder %v1212_v23, 0.0 }
 0x185   :  { %v1223_v12 = vmul.f32 %v1736_v7, %v1222_v18 }
 0x187   :  { %v1224_v25 = vmul.f32 0.5, %v1223_v12 }
 0x189   :  { %v1225_v53 = vsub.f32 1.5, %v1224_v25 }
 0x18a   :  { %v1738_v19 = vpop.eup %1737 }
 0x18b   :  { %v1226_v36 = vmul.f32 %v1736_v7, %v1225_v53  ;;  %v1234_v28 = vmul.f32 %v1738_v19, %v1212_v23  ;;  %v1215_v20 = vpop.f32.mrf.mxu3 }
 0x18c   :  { %1739 = vrsqrt.f32 %v1215_v20  ;;  %vm1252_vm3 = vcmp.eq.f32.partialorder %v1215_v20, inf  ;;  %v1255_v3 = vand.u32 2147483648, %v1215_v20  ;;  %vm1254_vm5 = vcmp.eq.f32.partialorder %v1215_v20, 0.0 }
 0x18d   :  { %v1227_v33 = vmul.f32 %v1226_v36, %v1209_v35  ;;  %v1235_v39 = vmul.f32 %v1738_v19, %v1234_v28 }
 0x18f   :  { %v1229_v37 = vsel %vm1228_vm4, %v1209_v35, %v1227_v33  ;;  %v1236_v48 = vmul.f32 0.5, %v1235_v39 }
 0x190   :  { %v1232_v58 = vsel %vm1230_vm12, %v1231_v21, %v1229_v37 }
 0x191   :  { %v1269_v27 = vmax.f32 %v1232_v58, 1e-12  ;;  %v1237_v2 = vsub.f32 1.5, %v1236_v48 }
 0x192   :  { %v1740_v6 = vpop.eup %1739 }
 0x193   :  { %1741 = vrcp.f32 %v1269_v27  ;;  %v1238_v8 = vmul.f32 %v1738_v19, %v1237_v2  ;;  %v1246_v22 = vmul.f32 %v1740_v6, %v1215_v20  ;;  %v3132_v13 = vpop.f32.mrf.mxu3  ;;  %v1284_v9 = vand.u32 2147483648, %v1269_v27 }
 0x194   :  { %1743 = vrsqrt.f32 %v3132_v13  ;;  %v1282_v30 = vand.u32 2147483647, %v1269_v27  ;;  %vm1278_vm8 = vweird.f32 %v1269_v27  ;;  %vm1264_vm1 = vcmp.eq.f32.partialorder %v3132_v13, inf }
 0x195   :  { %v1239_v17 = vmul.f32 %v1238_v8, %v1212_v23  ;;  %v1247_v38 = vmul.f32 %v1740_v6, %v1246_v22  ;;  %v1285_v12 = vor.u32 1.1754944e-38, %v1284_v9  ;;  %v1267_v48 = vand.u32 2147483648, %v3132_v13 }
 0x196   :  { %vm1283_vm14 = vcmp.eq.f32.partialorder %v1282_v30, 8.507059e+37  ;;  %vm1266_vm10 = vcmp.eq.f32.partialorder %v3132_v13, 0.0 }
 0x197   :  { %v1241_v31 = vsel %vm1240_vm7, %v1212_v23, %v1239_v17  ;;  %v1248_v29 = vmul.f32 0.5, %v1247_v38  ;;  %v649_v43 = vpop.f32.mrf.mxu2 }
 0x198   :  { %v662_v44 = vadd.f32 %v3135_v15, %v649_v43  ;;  %v1244_v47 = vsel %vm1242_vm0, %v1243_v26, %v1241_v31 }
 0x199   :  { %v1742_v50 = vpop.eup %1741  ;;  %v1249_v51 = vsub.f32 1.5, %v1248_v29  ;;  %v3138_v10 = vmax.f32 %v1244_v47, 1e-12 }
 0x19a   :  { %v1744_v56 = vpop.eup %1743  ;;  %v666_v61 = vsub.f32 0.0, %v662_v44  ;;  %v1274_v14 = vmul.f32 %v1742_v50, %v1269_v27  ;;  %vm1279_vm2 = vweird.f32 %v1742_v50 }
 0x19b   :  { %v1250_v57 = vmul.f32 %v1740_v6, %v1249_v51  ;;  %v1258_v32 = vmul.f32 %v1744_v56, %v3132_v13  ;;  %1745 = vrcp.f32 %v3138_v10  ;;  %vm1280_vm11 = vmor %vm1278_vm8, %vm1279_vm2  ;;  %v1299_v27 = vand.u32 2147483648, %v3138_v10 }
 0x19c   :  { %v670_v1 = vmul.f32 1.442695, %v666_v61  ;;  %v1275_v62 = vsub.f32 1.0, %v1274_v14  ;;  %v1297_v6 = vand.u32 2147483647, %v3138_v10  ;;  %vm1293_vm15 = vweird.f32 %v3138_v10 }
 0x19d   :  { %v1251_v59 = vmul.f32 %v1250_v57, %v1215_v20  ;;  %v1259_v5 = vmul.f32 %v1744_v56, %v1258_v32  ;;  %v1300_v43 = vor.u32 1.1754944e-38, %v1299_v27 }
 0x19e   :  { %1747 = vpow2.f32 %v670_v1  ;;  %v1276_v11 = vmul.f32 %v1742_v50, %v1275_v62  ;;  %vm1298_vm12 = vcmp.eq.f32.partialorder %v1297_v6, 8.507059e+37 }
 0x19f   :  { %v1253_v63 = vsel %vm1252_vm3, %v1215_v20, %v1251_v59  ;;  %v1260_v35 = vmul.f32 0.5, %v1259_v5  ;;  %v652_v34 = vpop.f32.mrf.mxu2 }
 0x1a0   :  { %v663_v24 = vadd.f32 %v3135_v15, %v652_v34  ;;  %v1277_v45 = vadd.f32 %v1742_v50, %v1276_v11  ;;  %v1256_v7 = vsel %vm1254_vm5, %v1255_v3, %v1253_v63 }
 0x1a1   :  { %v1746_v18 = vpop.eup %1745  ;;  %v1261_v23 = vsub.f32 1.5, %v1260_v35  ;;  %v3143_v25 = vmax.f32 %v1256_v7, 1e-12 }
 0x1a2   :  { %v667_v53 = vsub.f32 0.0, %v663_v24  ;;  %v1281_v19 = vsel %vm1280_vm11, %v1742_v50, %v1277_v45  ;;  %v1289_v36 = vmul.f32 %v1746_v18, %v3138_v10  ;;  %vm1294_vm6 = vweird.f32 %v1746_v18 }
 0x1a3   :  { %v1262_v28 = vmul.f32 %v1744_v56, %v1261_v23  ;;  %v1286_v20 = vsel %vm1283_vm14, %v1285_v12, %v1281_v19  ;;  %1749 = vrcp.f32 %v3143_v25  ;;  %vm1295_vm4 = vmor %vm1293_vm15, %vm1294_vm6  ;;  %v1312_v57 = vand.u32 2147483647, %v3143_v25 }
 0x1a4   :  { %v1748_v33 = vpop.eup %1747  ;;  %v672_v39 = vmul.f32 1.442695, %v667_v53  ;;  %1657 = vmatmul.msk.f32.vlgmr.msra.gmra.mxu0 %vm1333_vm13, %v1286_v20  ;;  %v1290_v21 = vsub.f32 1.0, %v1289_v36  ;;  %v1314_v32 = vand.u32 2147483648, %v3143_v25  ;;  %vm1308_vm0 = vweird.f32 %v3143_v25  ;;  %v3186_v20 = vld [vmem:[#allocation8 + $0x8] ss:$0 sm:$0xff] }
 0x1a5   :  { %v1263_v37 = vmul.f32 %v1262_v28, %v3132_v13  ;;  %v3151_v58 = vadd.f32 1.0, %v1748_v33  ;;  %vm1313_vm2 = vcmp.eq.f32.partialorder %v1312_v57, 8.507059e+37 }
 0x1a6   :  { %1751 = vpow2.f32 %v672_v39  ;;  %v1291_v2 = vmul.f32 %v1746_v18, %v1290_v21  ;;  %v1315_v63 = vor.u32 1.1754944e-38, %v1314_v32 }
 0x1a7   :  { %v1265_v8 = vsel %vm1264_vm1, %v3132_v13, %v1263_v37  ;;  %1753 = vrcp.f32 %v3151_v58  ;;  %v655_v22 = vpop.f32.mrf.mxu2  ;;  %v691_v11 = vand.u32 2147483647, %v3151_v58  ;;  %v693_v35 = vand.u32 2147483648, %v3151_v58  ;;  %v481_v37 = vpop.f32.mrf.mxu0 }
 0x1a8   :  { %v1268_v17 = vsel %vm1266_vm10, %v1267_v48, %v1265_v8  ;;  %v664_v38 = vadd.f32 %v3135_v15, %v655_v22  ;;  %v1292_v26 = vadd.f32 %v1746_v18, %v1291_v2  ;;  %vm687_vm5 = vweird.f32 %v3151_v58  ;;  %v3197_v8 = vld [vmem:[#allocation8 + $0x7] ss:$0 sm:$0xff] }
 0x1a9   :  { %v1750_v31 = vpop.eup %1749  ;;  %v3160_v29 = vmax.f32 %v1268_v17, 1e-12  ;;  %vm3179_vm11 = vcmp.eq.f32.partialorder %v691_v11, 8.507059e+37  ;;  %v694_v39 = vor.u32 1.1754944e-38, %v693_v35  ;;  %v3195_v2 = vadd.f32 %v3186_v20, %v481_v37 }
 0x1aa   :  { %v668_v44 = vsub.f32 0.0, %v664_v38  ;;  %v1296_v47 = vsel %vm1295_vm4, %v1746_v18, %v1292_v26  ;;  %v1304_v50 = vmul.f32 %v1750_v31, %v3143_v25  ;;  %vm1309_vm7 = vweird.f32 %v1750_v31 }
 0x1ab   :  { %1755 = vrcp.f32 %v3160_v29  ;;  %v1301_v13 = vsel %vm1298_vm12, %v1300_v43, %v1296_v47  ;;  %vm1310_vm3 = vmor %vm1308_vm0, %vm1309_vm7  ;;  %v1327_v25 = vand.u32 2147483647, %v3160_v29  ;;  %v1329_v28 = vand.u32 2147483648, %v3160_v29 }
 0x1ac   :  { %v1752_v51 = vpop.eup %1751  ;;  %v674_v56 = vmul.f32 1.442695, %v668_v44  ;;  %1658 = vmatmul.msk.f32.gmra.mxu0 %vm1333_vm13, %v1301_v13  ;;  %v1305_v61 = vsub.f32 1.0, %v1304_v50  ;;  %vm1323_vm6 = vweird.f32 %v3160_v29  ;;  %v498_v26 = vsub.f32 0.0, %v3195_v2 }
 0x1ad   :  { %v1754_v14 = vpop.eup %1753  ;;  %v3165_v10 = vadd.f32 1.0, %v1752_v51  ;;  %vm1328_vm10 = vcmp.eq.f32.partialorder %v1327_v25, 8.507059e+37  ;;  %v1330_v38 = vor.u32 1.1754944e-38, %v1329_v28 }
 0x1ae   :  { %1757 = vpow2.f32 %v674_v56  ;;  %v1306_v1 = vmul.f32 %v1750_v31, %v1305_v61  ;;  %v683_v62 = vmul.f32 %v1754_v14, %v3151_v58  ;;  %vm688_vm8 = vweird.f32 %v1754_v14 }
 0x1af   :  { %1759 = vrcp.f32 %v3165_v10  ;;  %v658_v59 = vpop.f32.mrf.mxu2  ;;  %vm689_vm1 = vmor %vm687_vm5, %vm688_vm8  ;;  %v708_v47 = vand.u32 2147483648, %v3165_v10  ;;  %v506_v13 = vand.u32 2147483647, %v498_v26  ;;  %vm702_vm12 = vweird.f32 %v3165_v10 }
 0x1b0   :  { %v665_v3 = vadd.f32 %v3135_v15, %v658_v59  ;;  %v1307_v5 = vadd.f32 %v1750_v31, %v1306_v1  ;;  %v684_v9 = vsub.f32 1.0, %v683_v62  ;;  %v484_v62 = vpop.f32.mrf.mxu0 }
 0x1b1   :  { %v1756_v30 = vpop.eup %1755  ;;  %v510_v32 = vsub.f32 0.0, %v506_v13 }
 0x1b2   :  { %v669_v34 = vsub.f32 0.0, %v665_v3  ;;  %v1311_v24 = vsel %vm1310_vm3, %v1750_v31, %v1307_v5  ;;  %v1319_v45 = vmul.f32 %v1756_v30, %v3160_v29  ;;  %v685_v18 = vmul.f32 %v1754_v14, %v684_v9 }
 0x1b3   :  { %v1316_v7 = vsel %vm1313_vm2, %v1315_v63, %v1311_v24  ;;  %vm1324_vm14 = vweird.f32 %v1756_v30  ;;  %v706_v29 = vand.u32 2147483647, %v3165_v10  ;;  %v709_v3 = vor.u32 1.1754944e-38, %v708_v47 }
 0x1b4   :  { %v1758_v15 = vpop.eup %1757  ;;  %v676_v23 = vmul.f32 1.442695, %v669_v34  ;;  %1659 = vmatmul.msk.f32.gmra.mxu0 %vm1333_vm13, %v1316_v7  ;;  %v1320_v12 = vsub.f32 1.0, %v1319_v45  ;;  %v686_v33 = vadd.f32 %v1754_v14, %v685_v18  ;;  %vm1325_vm15 = vmor %vm1323_vm6, %vm1324_vm14  ;;  %v514_v11 = vmul.f32 1.442695, %v510_v32 }
 0x1b5   :  { %v1760_v19 = vpop.eup %1759  ;;  %v3183_v36 = vadd.f32 1.0, %v1758_v15  ;;  %vm707_vm0 = vcmp.eq.f32.partialorder %v706_v29, 8.507059e+37 }
 0x1b6   :  { %1761 = vpow2.f32 %v676_v23  ;;  %v1321_v21 = vmul.f32 %v1756_v30, %v1320_v12  ;;  %v698_v48 = vmul.f32 %v1760_v19, %v3165_v10  ;;  %v690_v6 = vsel %vm689_vm1, %v1754_v14, %v686_v33  ;;  %v3232_v23 = vld [vmem:[#allocation8 + $0xa] ss:$0 sm:$0xff] }
 0x1b7   :  { %1763 = vrcp.f32 %v3183_v36  ;;  %v948_v27 = vpop.f32.mrf.mxu2  ;;  %v3202_v58 = vsel %vm3179_vm11, %v694_v39, %v690_v6  ;;  %vm703_vm4 = vweird.f32 %v1760_v19  ;;  %v723_v45 = vand.u32 2147483648, %v3183_v36 }
 0x1b8   :  { %1623 = vmatmul.msk.f32.gmra.mxu2 %vm958_vm9, %v948_v27  ;;  %v1322_v22 = vadd.f32 %v1756_v30, %v1321_v21  ;;  %v699_v17 = vsub.f32 1.0, %v698_v48  ;;  %v1661_v31 = vadd.f32 -1.0, %v3202_v58  ;;  %vm704_vm7 = vmor %vm702_vm12, %vm703_vm4  ;;  %v721_v18 = vand.u32 2147483647, %v3183_v36  ;;  %v487_v33 = vpop.f32.mrf.mxu0 }
 0x1b9   :  { %v724_v28 = vor.u32 1.1754944e-38, %v723_v45 }
 0x1ba   :  { %v1326_v43 = vsel %vm1325_vm15, %v1756_v30, %v1322_v22  ;;  %v700_v44 = vmul.f32 %v1760_v19, %v699_v17  ;;  %v1441_v51 = vmul.f32 %v3197_v8, %v1661_v31  ;;  %v3219_v30 = vadd.f32 %v3186_v20, %v484_v62 }
 0x1bb   :  { %v1331_v50 = vsel %vm1328_vm10, %v1330_v38, %v1326_v43  ;;  %vm722_vm2 = vcmp.eq.f32.partialorder %v721_v18, 8.507059e+37  ;;  %v3238_v22 = vadd.f32 %v3186_v20, %v487_v33 }
 0x1bc   :  { %v1762_v56 = vpop.eup %1761  ;;  %1660 = vmatmul.msk.f32.gmra.mxu0 %vm1333_vm13, %v1331_v50  ;;  %v701_v61 = vadd.f32 %v1760_v19, %v700_v44  ;;  %v1445_v1 = vadd.f32 1.0, %v1441_v51  ;;  %v499_v34 = vsub.f32 0.0, %v3219_v30 }
 0x1bd   :  { %v1764_v14 = vpop.eup %1763  ;;  %v3214_v57 = vadd.f32 1.0, %v1762_v56  ;;  %v500_v44 = vsub.f32 0.0, %v3238_v22 }
 0x1be   :  { %v705_v59 = vsel %vm704_vm7, %v1760_v19, %v701_v61  ;;  %v713_v5 = vmul.f32 %v1764_v14, %v3183_v36  ;;  %v1449_v10 = vmul.f32 %v1445_v1, %v2982_v40  ;;  %vm718_vm13 = vweird.f32 %v1764_v14 }
 0x1bf   :  { %1765 = vrcp.f32 %v3214_v57  ;;  %v951_v9 = vpop.f32.mrf.mxu2  ;;  %v3223_v63 = vsel %vm707_vm0, %v709_v3, %v705_v59  ;;  %v507_v40 = vand.u32 2147483647, %v499_v34  ;;  %v736_v37 = vand.u32 2147483647, %v3214_v57 }
 0x1c0   :  { %1624 = vmatmul.msk.f32.gmra.mxu2 %vm958_vm9, %v951_v9  ;;  %v714_v35 = vsub.f32 1.0, %v713_v5  ;;  %1767 = vpow2.f32 %v514_v11  ;;  %1453 = vst [vmem:[#allocation19] sm:$0xff] %v1449_v10  ;;  %v1662_v24 = vadd.f32 -1.0, %v3223_v63  ;;  %vm717_vm9 = vweird.f32 %v3183_v36  ;;  %v490_v62 = vpop.f32.mrf.mxu0 }
 0x1c1   :  { %v511_v53 = vsub.f32 0.0, %v507_v40  ;;  %vm719_vm3 = vmor %vm717_vm9, %vm718_vm13  ;;  %v738_v47 = vand.u32 2147483648, %v3214_v57  ;;  %v508_v51 = vand.u32 2147483647, %v500_v44  ;;  %vm732_vm8 = vweird.f32 %v3214_v57 }
 0x1c2   :  { %v715_v7 = vmul.f32 %v1764_v14, %v714_v35  ;;  %v1442_v15 = vmul.f32 %v3197_v8, %v1662_v24  ;;  %vm737_vm14 = vcmp.eq.f32.partialorder %v736_v37, 8.507059e+37  ;;  %v502_v11 = vmax.f32 %v498_v26, 0.0 }
 0x1c3   :  { %v516_v6 = vmul.f32 1.442695, %v511_v53  ;;  %v512_v32 = vsub.f32 0.0, %v508_v51  ;;  %v739_v1 = vor.u32 1.1754944e-38, %v738_v47  ;;  %v3255_v35 = vadd.f32 %v3186_v20, %v490_v62 }
 0x1c4   :  { %v716_v12 = vadd.f32 %v1764_v14, %v715_v7  ;;  %v1446_v19 = vadd.f32 1.0, %v1442_v15  ;;  %v503_v37 = vmax.f32 %v499_v34, 0.0  ;;  %v504_v30 = vmax.f32 %v500_v44, 0.0 }
 0x1c5   :  { %v1766_v25 = vpop.eup %1765  ;;  %1769 = vpow2.f32 %v516_v6  ;;  %v518_v10 = vmul.f32 1.442695, %v512_v32  ;;  %v501_v40 = vsub.f32 0.0, %v3255_v35 }
 0x1c6   :  { %v720_v39 = vsel %vm719_vm3, %v1764_v14, %v716_v12  ;;  %v728_v21 = vmul.f32 %v1766_v25, %v3214_v57  ;;  %v1768_v48 = vpop.eup %1767  ;;  %v1450_v36 = vmul.f32 %v1446_v19, %v2993_v41  ;;  %vm733_vm5 = vweird.f32 %v1766_v25 }
 0x1c7   :  { %v988_v27 = vpop.f32.mrf.mxu2  ;;  %v3241_v17 = vsel %vm722_vm2, %v724_v28, %v720_v39  ;;  %v522_v31 = vadd.f32 1.0, %v1768_v48  ;;  %vm734_vm11 = vmor %vm732_vm8, %vm733_vm5  ;;  %v509_v20 = vand.u32 2147483647, %v501_v40 }
 0x1c8   :  { %v1001_v38 = vadd.f32 %v3232_v23, %v988_v27  ;;  %v1663_v29 = vadd.f32 -1.0, %v3241_v17  ;;  %v729_v43 = vsub.f32 1.0, %v728_v21  ;;  %1454 = vst [vmem:[#allocation19 + $0x8] sm:$0xff] %v1450_v36 }
 0x1c9   :  { %1771 = vlog2.f32 %v522_v31  ;;  %v513_v33 = vsub.f32 0.0, %v509_v20 }
 0x1ca   :  { %v1005_v50 = vsub.f32 0.0, %v1001_v38  ;;  %v1443_v13 = vmul.f32 %v3197_v8, %v1663_v29  ;;  %v730_v41 = vmul.f32 %v1766_v25, %v729_v43 }
 0x1cb   :  { %v1770_v5 = vpop.eup %1769  ;;  %v520_v6 = vmul.f32 1.442695, %v513_v33 }
 0x1cc   :  { %v1009_v56 = vmul.f32 1.442695, %v1005_v50  ;;  %v1447_v61 = vadd.f32 1.0, %v1443_v13  ;;  %v731_v14 = vadd.f32 %v1766_v25, %v730_v41  ;;  %v523_v7 = vadd.f32 1.0, %v1770_v5 }
 0x1ce   :  { %1773 = vpow2.f32 %v1009_v56  ;;  %v1451_v59 = vmul.f32 %v1447_v61, %v3004_v52  ;;  %v735_v3 = vsel %vm734_vm11, %v1766_v25, %v731_v14 }
 0x1cf   :  { %v991_v9 = vpop.f32.mrf.mxu2  ;;  %v3257_v24 = vsel %vm737_vm14, %v739_v1, %v735_v3  ;;  %v1772_v57 = vpop.eup %1771  ;;  %1775 = vpow2.f32 %v518_v10  ;;  %v1081_v3 = vld [vmem:[#allocation7] sm:$0xff] }
 0x1d0   :  { %v1002_v45 = vadd.f32 %v3232_v23, %v991_v9  ;;  %1455 = vst [vmem:[#allocation19 + $0x10] sm:$0xff] %v1451_v59  ;;  %v1664_v52 = vadd.f32 -1.0, %v3257_v24  ;;  %v527_v18 = vmul.f32 0.6931472, %v1772_v57  ;;  %1777 = vlog2.f32 %v523_v7 }
 0x1d2   :  { %v1006_v15 = vsub.f32 0.0, %v1002_v45  ;;  %v1444_v2 = vmul.f32 %v3197_v8, %v1664_v52  ;;  %v534_v26 = vadd.f32 %v527_v18, %v502_v11  ;;  %v896_v11 = vpop.f32.mrf.mxu0  ;;  %v1085_v52 = vsub.f32 %v1081_v3, %v3104_v49 }
 0x1d3   :  { %1477 = vst [vmem:[#allocation25] sm:$0xff] %v896_v11 }
 0x1d4   :  { %v1774_v12 = vpop.eup %1773  ;;  %v1011_v25 = vmul.f32 1.442695, %v1006_v15  ;;  %v1448_v53 = vadd.f32 1.0, %v1444_v2  ;;  %v538_v28 = vsub.f32 0.0, %v534_v26 }
 0x1d5   :  { %v1017_v19 = vadd.f32 1.0, %v1774_v12  ;;  %v1776_v21 = vpop.eup %1775 }
 0x1d6   :  { %1779 = vpow2.f32 %v1011_v25  ;;  %v1452_v39 = vmul.f32 %v1448_v53, %v3015_v60  ;;  %v1778_v48 = vpop.eup %1777  ;;  %v1613_v8 = vadd.f32 -0.5, %v538_v28  ;;  %v524_v27 = vadd.f32 1.0, %v1776_v21 }
 0x1d7   :  { %1781 = vrcp.f32 %v1017_v19  ;;  %v529_v36 = vmul.f32 0.6931472, %v1778_v48  ;;  %vm1026_vm1 = vweird.f32 %v1017_v19  ;;  %v1032_v13 = vand.u32 2147483648, %v1017_v19  ;;  %v1082_v48 = vld [vmem:[#allocation7 + $0x8] sm:$0xff] }
 0x1d8   :  { %1456 = vst [vmem:[#allocation19 + $0x18] sm:$0xff] %v1452_v39  ;;  %v546_v38 = vmul.f32 1.442695, %v1613_v8  ;;  %1783 = vlog2.f32 %v524_v27  ;;  %v1030_v51 = vand.u32 2147483647, %v1017_v19  ;;  %v505_v39 = vmax.f32 %v501_v40, 0.0 }
 0x1d9   :  { %v535_v31 = vadd.f32 %v529_v36, %v503_v37  ;;  %1785 = vpow2.f32 %v520_v6  ;;  %v1033_v9 = vor.u32 1.1754944e-38, %v1032_v13 }
 0x1da   :  { %1787 = vpow2.f32 %v546_v38  ;;  %vm1031_vm15 = vcmp.eq.f32.partialorder %v1030_v51, 8.507059e+37  ;;  %v899_v36 = vpop.f32.mrf.mxu0 }
 0x1db   :  { %v539_v60 = vsub.f32 0.0, %v535_v31  ;;  %1478 = vst [vmem:[#allocation25 + $0x8] sm:$0xff] %v899_v36 }
 0x1dc   :  { %v1780_v29 = vpop.eup %1779 }
 0x1dd   :  { %v1782_v43 = vpop.eup %1781  ;;  %v1018_v47 = vadd.f32 1.0, %v1780_v29  ;;  %v1614_v56 = vadd.f32 -0.5, %v539_v60 }
 0x1de   :  { %v1022_v50 = vmul.f32 %v1782_v43, %v1017_v19  ;;  %v1784_v34 = vpop.eup %1783  ;;  %vm1027_vm6 = vweird.f32 %v1782_v43 }
 0x1df   :  { %1789 = vrcp.f32 %v1018_v47  ;;  %v1786_v61 = vpop.eup %1785  ;;  %v531_v14 = vmul.f32 0.6931472, %v1784_v34  ;;  %v548_v62 = vmul.f32 1.442695, %v1614_v56  ;;  %vm3271_vm10 = vmor %vm1026_vm1, %vm1027_vm6  ;;  %vm1041_vm4 = vweird.f32 %v1018_v47 }
 0x1e0   :  { %v1023_v41 = vsub.f32 1.0, %v1022_v50  ;;  %v1788_v32 = vpop.eup %1787  ;;  %v525_v59 = vadd.f32 1.0, %v1786_v61  ;;  %v1047_v2 = vand.u32 2147483648, %v1018_v47  ;;  %v1045_v25 = vand.u32 2147483647, %v1018_v47 }
 0x1e1   :  { %v554_v22 = vsub.f32 0.0, %v1788_v32  ;;  %v536_v44 = vadd.f32 %v531_v14, %v504_v30  ;;  %1791 = vpow2.f32 %v548_v62 }
 0x1e2   :  { %v1024_v1 = vmul.f32 %v1782_v43, %v1023_v41  ;;  %1793 = vlog2.f32 %v525_v59  ;;  %v1048_v27 = vor.u32 1.1754944e-38, %v1047_v2  ;;  %vm1046_vm0 = vcmp.eq.f32.partialorder %v1045_v25, 8.507059e+37  ;;  %v902_v51 = vpop.f32.mrf.mxu0 }
 0x1e3   :  { %v558_v45 = vmul.f32 1.442695, %v554_v22  ;;  %v540_v7 = vsub.f32 0.0, %v536_v44  ;;  %1479 = vst [vmem:[#allocation25 + $0x10] sm:$0xff] %v902_v51 }
 0x1e4   :  { %v1025_v10 = vadd.f32 %v1782_v43, %v1024_v1 }
 0x1e5   :  { %v1790_v57 = vpop.eup %1789  ;;  %1795 = vpow2.f32 %v558_v45  ;;  %v1615_v26 = vadd.f32 -0.5, %v540_v7 }
 0x1e6   :  { %v1037_v18 = vmul.f32 %v1790_v57, %v1018_v47  ;;  %v1029_v15 = vsel %vm3271_vm10, %v1782_v43, %v1025_v10  ;;  %vm1042_vm12 = vweird.f32 %v1790_v57 }
 0x1e7   :  { %v1034_v20 = vsel %vm1031_vm15, %v1033_v9, %v1029_v15  ;;  %v550_v19 = vmul.f32 1.442695, %v1615_v26  ;;  %v1792_v28 = vpop.eup %1791  ;;  %vm3282_vm7 = vmor %vm1041_vm4, %vm1042_vm12 }
 0x1e8   :  { %v1038_v12 = vsub.f32 1.0, %v1037_v18  ;;  %v1089_v53 = vmul.f32 %v1085_v52, %v1034_v20  ;;  %v1794_v37 = vpop.eup %1793  ;;  %v555_v6 = vsub.f32 0.0, %v1792_v28 }
 0x1e9   :  { %1797 = vpow2.f32 %v550_v19  ;;  %v533_v31 = vmul.f32 0.6931472, %v1794_v37 }
 0x1ea   :  { %v1039_v33 = vmul.f32 %v1790_v57, %v1038_v12  ;;  %v1093_v21 = vadd.f32 %v1089_v53, %v3104_v49  ;;  %v560_v35 = vmul.f32 1.442695, %v555_v6  ;;  %v1086_v49 = vsub.f32 %v1082_v48, %v3117_v4  ;;  %v905_v32 = vpop.f32.mrf.mxu0 }
 0x1eb   :  { %v1796_v29 = vpop.eup %1795  ;;  %v537_v40 = vadd.f32 %v533_v31, %v505_v39  ;;  %1480 = vst [vmem:[#allocation25 + $0x18] sm:$0xff] %v905_v32 }
 0x1ec   :  { %v1040_v38 = vadd.f32 %v1790_v57, %v1039_v33  ;;  %1457 = vst [vmem:[#allocation20] sm:$0xff] %v1093_v21  ;;  %1799 = vpow2.f32 %v560_v35 }
 0x1ed   :  { %1431 = vst [vmem:[#allocation17] sm:$0xff] %v1796_v29  ;;  %v541_v60 = vsub.f32 0.0, %v537_v40 }
 0x1ee   :  { %v1044_v43 = vsel %vm3282_vm7, %v1790_v57, %v1040_v38 }
 0x1ef   :  { %v1049_v47 = vsel %vm1046_vm0, %v1048_v27, %v1044_v43  ;;  %v1798_v13 = vpop.eup %1797  ;;  %v1616_v34 = vadd.f32 -0.5, %v541_v60  ;;  %v1083_v27 = vld [vmem:[#allocation7 + $0x10] sm:$0xff] }
 0x1f0   :  { %v1090_v50 = vmul.f32 %v1086_v49, %v1049_v47  ;;  %v556_v30 = vsub.f32 0.0, %v1798_v13  ;;  %v1087_v38 = vsub.f32 %v1083_v27, %v3127_v55  ;;  %v1084_v13 = vld [vmem:[#allocation7 + $0x18] sm:$0xff] }
 0x1f1   :  { %v552_v61 = vmul.f32 1.442695, %v1616_v34 }
 0x1f2   :  { %v1094_v41 = vadd.f32 %v1090_v50, %v3117_v4  ;;  %v562_v56 = vmul.f32 1.442695, %v556_v30  ;;  %v1800_v14 = vpop.eup %1799 }
 0x1f3   :  { %1432 = vst [vmem:[#allocation17 + $0x8] sm:$0xff] %v1800_v14 }
 0x1f4   :  { %1458 = vst [vmem:[#allocation20 + $0x8] sm:$0xff] %v1094_v41  ;;  %1801 = vpow2.f32 %v562_v56  ;;  %v1088_v41 = vsub.f32 %v1084_v13, %v3130_v16 }
 0x1f5   :  { %1803 = vpow2.f32 %v552_v61 }
 0x1fa   :  { %v1802_v1 = vpop.eup %1801 }
 0x1fb   :  { %v1804_v62 = vpop.eup %1803  ;;  %1433 = vst [vmem:[#allocation17 + $0x10] sm:$0xff] %v1802_v1 }
 0x1fc   :  { %v557_v59 = vsub.f32 0.0, %v1804_v62 }
 0x1fe   :  { %v564_v3 = vmul.f32 1.442695, %v557_v59 }
 0x200   :  { %1805 = vpow2.f32 %v564_v3 }
 0x206   :  { %v1806_v4 = vpop.eup %1805 }
 0x207   :  { %1434 = vst [vmem:[#allocation17 + $0x18] sm:$0xff] %v1806_v4 }
 0x208   :  { %1506 = dma.vmem_to_hbm [thread:$0]  %s1499_s19, 512, %s1501_s9, [#allocation18], %s2194_s5, %s2194_s5, %s2195_s22  }
 0x209   :  { %1519 = dma.vmem_to_hbm [thread:$0]  %s1512_s27, 512, %s1514_s10, [#allocation18], %s2194_s5, %s2194_s5, %s2195_s22  }
 0x20a   :  { %s3429_s19 = sld [smem:[#allocation41_spill]] }
 0x210   :  { %s1539_s25 = sshll.u32 %s3429_s19, 4  ;;  %s1540_s25 = int_to_ptr.hbm [resolvable:$true] %s1539_s25 }
 0x221   :  { %v1411_v5 = vpop.f32.mrf.mxu0 }
 0x222   :  { %v1423_v9 = vmul.f32 %v1411_v5, %v2985_v42 }
 0x224   :  { %v1461_v22 = vsub.f32 0.0, %v1423_v9  ;;  %v1469_v44 = vmul.f32 %v1423_v9, %v3202_v58 }
 0x226   :  { %1465 = vst [vmem:[#allocation22] sm:$0xff] %v1461_v22 }
 0x227   :  { %1473 = vst [vmem:[#allocation23] sm:$0xff] %v1469_v44 }
 0x229   :  { %v1414_v11 = vpop.f32.mrf.mxu0 }
 0x22a   :  { %v1424_v10 = vmul.f32 %v1414_v11, %v2996_v46 }
 0x22c   :  { %v1462_v57 = vsub.f32 0.0, %v1424_v10  ;;  %v1470_v45 = vmul.f32 %v1424_v10, %v3223_v63 }
 0x22e   :  { %1466 = vst [vmem:[#allocation22 + $0x8] sm:$0xff] %v1462_v57 }
 0x22f   :  { %1474 = vst [vmem:[#allocation23 + $0x8] sm:$0xff] %v1470_v45 }
 0x231   :  { %v1417_v7 = vpop.f32.mrf.mxu0 }
 0x232   :  { %v1425_v52 = vmul.f32 %v1417_v7, %v3007_v54 }
 0x234   :  { %v1463_v18 = vsub.f32 0.0, %v1425_v52  ;;  %v1471_v15 = vmul.f32 %v1425_v52, %v3241_v17 }
 0x236   :  { %1467 = vst [vmem:[#allocation22 + $0x10] sm:$0xff] %v1463_v18 }
 0x237   :  { %1475 = vst [vmem:[#allocation23 + $0x10] sm:$0xff] %v1471_v15 }
 0x239   :  { %v1420_v42 = vpop.f32.mrf.mxu0 }
 0x23a   :  { %v1426_v58 = vmul.f32 %v1420_v42, %v3018_v0 }
 0x23b   :  { %v994_v46 = vpop.f32.mrf.mxu2 }
 0x23c   :  { %v1464_v54 = vsub.f32 0.0, %v1426_v58  ;;  %v1472_v63 = vmul.f32 %v1426_v58, %v3257_v24  ;;  %v1003_v17 = vadd.f32 %v3232_v23, %v994_v46 }
 0x23e   :  { %1468 = vst [vmem:[#allocation22 + $0x18] sm:$0xff] %v1464_v54  ;;  %v1007_v0 = vsub.f32 0.0, %v1003_v17 }
 0x23f   :  { %1476 = vst [vmem:[#allocation23 + $0x18] sm:$0xff] %v1472_v63 }
 0x240   :  { %v1013_v2 = vmul.f32 1.442695, %v1007_v0  ;;  %1558 = dma.vmem_to_hbm [thread:$0]  %s1551_s17, 512, %s1553_s23, [#allocation24], %s2194_s5, %s2194_s5, %s2195_s22  }
 0x241   :  { %1571 = dma.vmem_to_hbm [thread:$0]  %s1564_s2, 512, %s1566_s30, [#allocation24], %s2194_s5, %s2194_s5, %s2195_s22  }
 0x242   :  { %1807 = vpow2.f32 %v1013_v2 }
 0x243   :  { %v997_v24 = vpop.f32.mrf.mxu2 }
 0x244   :  { %v1004_v26 = vadd.f32 %v3232_v23, %v997_v24 }
 0x246   :  { %v1008_v20 = vsub.f32 0.0, %v1004_v26 }
 0x248   :  { %v1808_v12 = vpop.eup %1807  ;;  %v1015_v25 = vmul.f32 1.442695, %v1008_v20 }
 0x249   :  { %v1019_v53 = vadd.f32 1.0, %v1808_v12 }
 0x24a   :  { %1809 = vpow2.f32 %v1015_v25 }
 0x24b   :  { %1811 = vrcp.f32 %v1019_v53  ;;  %v1062_v37 = vand.u32 2147483648, %v1019_v53  ;;  %v1060_v8 = vand.u32 2147483647, %v1019_v53  ;;  %vm1056_vm9 = vweird.f32 %v1019_v53 }
 0x24d   :  { %v1063_v36 = vor.u32 1.1754944e-38, %v1062_v37  ;;  %vm1061_vm2 = vcmp.eq.f32.partialorder %v1060_v8, 8.507059e+37 }
 0x250   :  { %v1810_v19 = vpop.eup %1809 }
 0x251   :  { %v1812_v28 = vpop.eup %1811  ;;  %v1020_v33 = vadd.f32 1.0, %v1810_v19 }
 0x252   :  { %v1052_v39 = vmul.f32 %v1812_v28, %v1019_v53  ;;  %vm1057_vm13 = vweird.f32 %v1812_v28 }
 0x253   :  { %1813 = vrcp.f32 %v1020_v33  ;;  %vm1058_vm3 = vmor %vm1056_vm9, %vm1057_vm13  ;;  %v1077_v43 = vand.u32 2147483648, %v1020_v33  ;;  %v1075_v60 = vand.u32 2147483647, %v1020_v33  ;;  %vm1071_vm8 = vweird.f32 %v1020_v33 }
 0x254   :  { %v1053_v21 = vsub.f32 1.0, %v1052_v39 }
 0x255   :  { %v1078_v34 = vor.u32 1.1754944e-38, %v1077_v43  ;;  %vm1076_vm14 = vcmp.eq.f32.partialorder %v1075_v60, 8.507059e+37 }
 0x256   :  { %v1054_v48 = vmul.f32 %v1812_v28, %v1053_v21 }
 0x258   :  { %v1055_v6 = vadd.f32 %v1812_v28, %v1054_v48 }
 0x259   :  { %v1814_v23 = vpop.eup %1813 }
 0x25a   :  { %v1067_v31 = vmul.f32 %v1814_v23, %v1020_v33  ;;  %v1059_v29 = vsel %vm1058_vm3, %v1812_v28, %v1055_v6  ;;  %vm1072_vm5 = vweird.f32 %v1814_v23 }
 0x25b   :  { %v1064_v35 = vsel %vm1061_vm2, %v1063_v36, %v1059_v29  ;;  %vm1073_vm11 = vmor %vm1071_vm8, %vm1072_vm5 }
 0x25c   :  { %v1068_v49 = vsub.f32 1.0, %v1067_v31  ;;  %v1091_v40 = vmul.f32 %v1087_v38, %v1064_v35 }
 0x25e   :  { %v1069_v47 = vmul.f32 %v1814_v23, %v1068_v49  ;;  %v1095_v50 = vadd.f32 %v1091_v40, %v3127_v55 }
 0x260   :  { %v1070_v30 = vadd.f32 %v1814_v23, %v1069_v47  ;;  %1459 = vst [vmem:[#allocation20 + $0x10] sm:$0xff] %v1095_v50 }
 0x262   :  { %v1074_v51 = vsel %vm1073_vm11, %v1814_v23, %v1070_v30 }
 0x263   :  { %v1079_v56 = vsel %vm1076_vm14, %v1078_v34, %v1074_v51 }
 0x264   :  { %v1092_v61 = vmul.f32 %v1088_v41, %v1079_v56 }
 0x266   :  { %v1096_v55 = vadd.f32 %v1092_v61, %v3130_v16 }
 0x268   :  { %1460 = vst [vmem:[#allocation20 + $0x18] sm:$0xff] %v1096_v55 }
 0x269   :  { %1532 = dma.vmem_to_hbm [thread:$0]  %s1525_s21, 512, %s1527_s14, [#allocation21], %s2194_s5, %s2194_s5, %s2195_s22  }
 0x26a   :  { %1545 = dma.vmem_to_hbm [thread:$0]  %s1538_s3, 512, %s1540_s25, [#allocation21], %s2194_s5, %s2194_s5, %s2195_s22  }
 0x26b   :  { %2185 = dma.done.wait [#allocation4], 512  }
 0x26c   :  { %2186 = vsyncadd [#allocation4], 4294966784 }
 0x26d   :  { %2187 = dma.done.wait [#allocation18], 1024  }
 0x26e   :  { %2188 = vsyncadd [#allocation18], 4294966272 }
 0x26f   :  { %2189 = dma.done.wait [#allocation21], 1024  }
 0x270   :  { %2190 = vsyncadd [#allocation21], 4294966272 }
 0x271   :  { %2191 = dma.done.wait [#allocation24], 1024  }
 0x272   :  { %2192 = vsyncadd [#allocation24], 4294966272 }
 0x273   :  { %1600 = vsyncpa [#allocation3], 1 }
 0x274   :  { %1601 = vsyncpa [#allocation6], 1 }
 0x275   :  { %1602 = vsyncpa [#allocation9], 1 }
 0x276   :  { %1603 = vsyncpa [#allocation12], 1 }
 0x277   :  { %1604 = vsyncpa [#allocation15], 1 }
 0x278   :  { %1605 = vsyncpa [#allocation4], 1 }
 0x279   :  { %1606 = vsyncpa [#allocation18], 1 }
 0x27a   :  { %1607 = vsyncpa [#allocation21], 1 }
 0x27b   :  { %1608 = vsyncpa [#allocation24], 1 }

</bundles_post_ra>
